<compile_context>
chip_gen: v5e
topology: v5e:2x2
jax: 0.10.0
libtpu: 0.0.40
codegen_flags: <defaults>
</compile_context>

<pallas_src>
import jax
import jax.numpy as jnp
from jax.experimental import pallas as pl
from jax.experimental.pallas import tpu as pltpu


# Logical layer dims (PyTorch Net) and their 128-lane-padded counterparts.
_IN = 784
_DIMS = [(784, 392), (392, 146), (146, 73), (73, 10)]
_PAD_IN = [784, 512, 256, 128]    # padded input dim of fc1..fc4 (K of fc1 NOT padded)
_PAD_OUT = [512, 256, 128, 128]   # padded output dim of fc1..fc4


def _round_up(n, m):
    return ((n + m - 1) // m) * m


def mlp_kernel(x_ref,
               w1_ref, b1_ref,
               w2_ref, b2_ref,
               w3_ref, b3_ref,
               w4_ref, b4_ref,
               o_ref):
    # x tile: (TB, 784) f32 — cast to bf16 in-kernel (saves a wrapper-side HBM pass).
    x = x_ref[...].astype(jnp.bfloat16)

    # fc1 + relu (dropout = identity at inference)
    h = jnp.dot(x, w1_ref[...], preferred_element_type=jnp.float32) + b1_ref[...]
    h = jnp.maximum(h, 0.0).astype(jnp.bfloat16)

    # fc2 + relu
    h = jnp.dot(h, w2_ref[...], preferred_element_type=jnp.float32) + b2_ref[...]
    h = jnp.maximum(h, 0.0).astype(jnp.bfloat16)

    # fc3 + relu
    h = jnp.dot(h, w3_ref[...], preferred_element_type=jnp.float32) + b3_ref[...]
    h = jnp.maximum(h, 0.0).astype(jnp.bfloat16)

    # fc4 + sigmoid (f32 math, bf16 store; padded columns sliced off in the wrapper)
    z = jnp.dot(h, w4_ref[...], preferred_element_type=jnp.float32) + b4_ref[...]
    o_ref[...] = jax.nn.sigmoid(z).astype(jnp.bfloat16)


def prepare_params(params):
    """One-time prep (call ONCE, outside the per-forward path):
    zero-pad weights/biases to 128-lane dims; weights -> bf16, biases -> f32 (1, N_pad)."""
    prepared = []
    for (w, b), p_in, p_out in zip(params, _PAD_IN, _PAD_OUT):
        fi, fo = w.shape
        w_p = jnp.zeros((p_in, p_out), jnp.bfloat16)
        w_p = w_p.at[:fi, :fo].set(w.astype(jnp.bfloat16))
        b_p = jnp.zeros((1, p_out), jnp.float32)
        b_p = b_p.at[:, :fo].set(b.reshape(1, fo).astype(jnp.float32))
        prepared.append((w_p, b_p))
    return tuple(prepared)


def net_forward(x_nchw, prepared_params, *, block_b=2048):
    """x_nchw: (B, 1, 28, 28) float32.  prepared_params: output of prepare_params().
    Returns (B, 10) bfloat16 sigmoid probabilities."""
    B = x_nchw.shape[0]
    x = x_nchw.reshape(B, _IN)  # torch: x.view(-1, 784); stays f32 (cast is in-kernel)

    # Batch tile: multiple of 16, capped at block_b; for large batches force >= 2 grid
    # steps so the "parallel" axis shards across both v7x TensorCores.
    TB = min(block_b, _round_up(B, 16))
    half = _round_up(pl.cdiv(B, 2), 16)
    if half >= 128:
        TB = min(TB, half)
    B_pad = _round_up(B, TB)
    if B_pad != B:
        x = jnp.pad(x, ((0, B_pad - B), (0, 0)))

    (w1, b1), (w2, b2), (w3, b3), (w4, b4) = prepared_params
    inputs = (x, w1, b1, w2, b2, w3, b3, w4, b4)

    grid = (B_pad // TB,)

    def resident(a):
        # Constant block index -> stays VMEM-resident across all grid steps;
        # single-buffered (no point double-buffering operands that never change).
        return pl.BlockSpec(a.shape, lambda i: (0, 0), pipeline_mode=pl.Buffered(1))

    in_specs = [pl.BlockSpec((TB, _IN), lambda i: (i, 0))] + \
               [resident(a) for a in inputs[1:]]
    out_spec = pl.BlockSpec((TB, _PAD_OUT[-1]), lambda i: (i, 0))

    flops = 2 * B_pad * sum(pi * po for pi, po in zip(_PAD_IN, _PAD_OUT))
    bytes_accessed = (x.size * 4                                         # f32 x stream
                      + sum(w.size * 2 + b.size * 4
                            for w, b in prepared_params)                 # bf16 w, f32 b
                      + B_pad * _PAD_OUT[-1] * 2)                        # bf16 output

    out = pl.pallas_call(
        mlp_kernel,
        out_shape=jax.ShapeDtypeStruct((B_pad, _PAD_OUT[-1]), jnp.bfloat16),
        grid=grid,
        in_specs=in_specs,
        out_specs=out_spec,
        compiler_params=pltpu.CompilerParams(
            dimension_semantics=("parallel",),
            vmem_limit_bytes=(48 << 20) if TB >= 1024 else None),
        cost_estimate=pl.CostEstimate(
            flops=flops,
            transcendentals=B_pad * _PAD_OUT[-1],
            bytes_accessed=bytes_accessed),
    )(*inputs)

    # Drop batch padding and the zero-padded (sigmoid(0)=0.5) output columns.
    return out[:B, :10]


def init_params(key):
    """Deterministic init.  Weights stored as (in, out); biases as (1, out). f32."""
    params = []
    for i, (fan_in, fan_out) in enumerate(_DIMS):
        kw, kb, key = jax.random.split(jax.random.fold_in(key, i), 3)
        bound = 1.0 / jnp.sqrt(fan_in)
        w = jax.random.uniform(kw, (fan_in, fan_out), jnp.float32, -bound, bound)
        b = jax.random.uniform(kb, (1, fan_out), jnp.float32, -bound, bound)
        params.append((w, b))
    return params


if __name__ == "__main__":
    key = jax.random.PRNGKey(0)
    k_x, k_p = jax.random.split(key)

    params = init_params(k_p)
    prepared = prepare_params(params)          # one-time weight prep (hoisted)
    x = jax.random.normal(k_x, (2, 1, 28, 28), dtype=jnp.float32)  # NCHW

    out = net_forward(x, prepared)
    out = jax.block_until_ready(out)

    assert out.shape == (2, 10)
    assert jnp.all((out >= 0.0) & (out <= 1.0))  # sigmoid range sanity check
    print("KERNEL_OK")
</pallas_src>

<mosaic_0001>
module attributes {stable_mosaic.version = 11 : i64} {
  func.func @mlp_kernel(%arg0: i32, %arg1: memref<16x784xf32, #tpu.memory_space<vmem>>, %arg2: memref<784x512xbf16, #tpu.memory_space<vmem>>, %arg3: memref<1x512xf32, #tpu.memory_space<vmem>>, %arg4: memref<512x256xbf16, #tpu.memory_space<vmem>>, %arg5: memref<1x256xf32, #tpu.memory_space<vmem>>, %arg6: memref<256x128xbf16, #tpu.memory_space<vmem>>, %arg7: memref<1x128xf32, #tpu.memory_space<vmem>>, %arg8: memref<128x128xbf16, #tpu.memory_space<vmem>>, %arg9: memref<1x128xf32, #tpu.memory_space<vmem>>, %arg10: memref<16x128xbf16, #tpu.memory_space<vmem>>) attributes {dimension_semantics = [#tpu.dimension_semantics<parallel>], iteration_bounds = array<i64: 1>, scalar_prefetch = 0 : i64, scratch_operands = 0 : i64, tpu.core_type = #tpu.core_type<tc>, window_params = [{transform_indices = @transform_0, window_bounds = array<i64: 16, 784>}, {pipeline_mode = #tpu.pipeline_mode<synchronous>, transform_indices = @transform_1, window_bounds = array<i64: 784, 512>}, {pipeline_mode = #tpu.pipeline_mode<synchronous>, transform_indices = @transform_2, window_bounds = array<i64: 1, 512>}, {pipeline_mode = #tpu.pipeline_mode<synchronous>, transform_indices = @transform_3, window_bounds = array<i64: 512, 256>}, {pipeline_mode = #tpu.pipeline_mode<synchronous>, transform_indices = @transform_4, window_bounds = array<i64: 1, 256>}, {pipeline_mode = #tpu.pipeline_mode<synchronous>, transform_indices = @transform_5, window_bounds = array<i64: 256, 128>}, {pipeline_mode = #tpu.pipeline_mode<synchronous>, transform_indices = @transform_6, window_bounds = array<i64: 1, 128>}, {pipeline_mode = #tpu.pipeline_mode<synchronous>, transform_indices = @transform_7, window_bounds = array<i64: 128, 128>}, {pipeline_mode = #tpu.pipeline_mode<synchronous>, transform_indices = @transform_8, window_bounds = array<i64: 1, 128>}, {transform_indices = @transform_9, window_bounds = array<i64: 16, 128>}]} {
    %c0 = arith.constant 0 : index
    %c0_0 = arith.constant 0 : index
    %0 = vector.load %arg1[%c0, %c0_0] : memref<16x784xf32, #tpu.memory_space<vmem>>, vector<16x784xf32>
    %1 = arith.truncf %0 : vector<16x784xf32> to vector<16x784xbf16>
    %c0_1 = arith.constant 0 : index
    %c0_2 = arith.constant 0 : index
    %2 = vector.load %arg2[%c0_1, %c0_2] : memref<784x512xbf16, #tpu.memory_space<vmem>>, vector<784x512xbf16>
    %cst = arith.constant dense<0.000000e+00> : vector<16x512xf32>
    %3 = tpu.matmul %1, %2, %cst {dimension_numbers = #tpu.dot_dimension_numbers<[1], [0], [0], [1], [0, 0, 1, 1], [], []>} : vector<16x784xbf16>, vector<784x512xbf16>, vector<16x512xf32> -> vector<16x512xf32>
    %c0_3 = arith.constant 0 : index
    %c0_4 = arith.constant 0 : index
    %4 = vector.load %arg3[%c0_3, %c0_4] : memref<1x512xf32, #tpu.memory_space<vmem>>, vector<1x512xf32>
    %5 = vector.broadcast %4 : vector<1x512xf32> to vector<16x512xf32>
    %6 = arith.addf %3, %5 : vector<16x512xf32>
    %cst_5 = arith.constant 0.000000e+00 : f32
    %7 = vector.broadcast %cst_5 : f32 to vector<16x512xf32>
    %8 = arith.maximumf %6, %7 : vector<16x512xf32>
    %9 = arith.truncf %8 : vector<16x512xf32> to vector<16x512xbf16>
    %c0_6 = arith.constant 0 : index
    %c0_7 = arith.constant 0 : index
    %10 = vector.load %arg4[%c0_6, %c0_7] : memref<512x256xbf16, #tpu.memory_space<vmem>>, vector<512x256xbf16>
    %cst_8 = arith.constant dense<0.000000e+00> : vector<16x256xf32>
    %11 = tpu.matmul %9, %10, %cst_8 {dimension_numbers = #tpu.dot_dimension_numbers<[1], [0], [0], [1], [0, 0, 1, 1], [], []>} : vector<16x512xbf16>, vector<512x256xbf16>, vector<16x256xf32> -> vector<16x256xf32>
    %c0_9 = arith.constant 0 : index
    %c0_10 = arith.constant 0 : index
    %12 = vector.load %arg5[%c0_9, %c0_10] : memref<1x256xf32, #tpu.memory_space<vmem>>, vector<1x256xf32>
    %13 = vector.broadcast %12 : vector<1x256xf32> to vector<16x256xf32>
    %14 = arith.addf %11, %13 : vector<16x256xf32>
    %cst_11 = arith.constant 0.000000e+00 : f32
    %15 = vector.broadcast %cst_11 : f32 to vector<16x256xf32>
    %16 = arith.maximumf %14, %15 : vector<16x256xf32>
    %17 = arith.truncf %16 : vector<16x256xf32> to vector<16x256xbf16>
    %c0_12 = arith.constant 0 : index
    %c0_13 = arith.constant 0 : index
    %18 = vector.load %arg6[%c0_12, %c0_13] : memref<256x128xbf16, #tpu.memory_space<vmem>>, vector<256x128xbf16>
    %cst_14 = arith.constant dense<0.000000e+00> : vector<16x128xf32>
    %19 = tpu.matmul %17, %18, %cst_14 {dimension_numbers = #tpu.dot_dimension_numbers<[1], [0], [0], [1], [0, 0, 1, 1], [], []>} : vector<16x256xbf16>, vector<256x128xbf16>, vector<16x128xf32> -> vector<16x128xf32>
    %c0_15 = arith.constant 0 : index
    %c0_16 = arith.constant 0 : index
    %20 = vector.load %arg7[%c0_15, %c0_16] : memref<1x128xf32, #tpu.memory_space<vmem>>, vector<1x128xf32>
    %21 = vector.broadcast %20 : vector<1x128xf32> to vector<16x128xf32>
    %22 = arith.addf %19, %21 : vector<16x128xf32>
    %cst_17 = arith.constant 0.000000e+00 : f32
    %23 = vector.broadcast %cst_17 : f32 to vector<16x128xf32>
    %24 = arith.maximumf %22, %23 : vector<16x128xf32>
    %25 = arith.truncf %24 : vector<16x128xf32> to vector<16x128xbf16>
    %c0_18 = arith.constant 0 : index
    %c0_19 = arith.constant 0 : index
    %26 = vector.load %arg8[%c0_18, %c0_19] : memref<128x128xbf16, #tpu.memory_space<vmem>>, vector<128x128xbf16>
    %cst_20 = arith.constant dense<0.000000e+00> : vector<16x128xf32>
    %27 = tpu.matmul %25, %26, %cst_20 {dimension_numbers = #tpu.dot_dimension_numbers<[1], [0], [0], [1], [0, 0, 1, 1], [], []>} : vector<16x128xbf16>, vector<128x128xbf16>, vector<16x128xf32> -> vector<16x128xf32>
    %c0_21 = arith.constant 0 : index
    %c0_22 = arith.constant 0 : index
    %28 = vector.load %arg9[%c0_21, %c0_22] : memref<1x128xf32, #tpu.memory_space<vmem>>, vector<1x128xf32>
    %29 = vector.broadcast %28 : vector<1x128xf32> to vector<16x128xf32>
    %30 = arith.addf %27, %29 : vector<16x128xf32>
    %31 = arith.negf %30 : vector<16x128xf32>
    %32 = math.exp %31 : vector<16x128xf32>
    %cst_23 = arith.constant 1.000000e+00 : f32
    %33 = vector.broadcast %cst_23 : f32 to vector<16x128xf32>
    %34 = arith.addf %33, %32 : vector<16x128xf32>
    %35 = arith.divf %33, %34 : vector<16x128xf32>
    %36 = arith.truncf %35 : vector<16x128xf32> to vector<16x128xbf16>
    %c0_24 = arith.constant 0 : index
    %c0_25 = arith.constant 0 : index
    %37 = vector.load %arg10[%c0_24, %c0_25] : memref<16x128xbf16, #tpu.memory_space<vmem>>, vector<16x128xbf16>
    tpu.vector_store %arg10[%c0_24, %c0_25], %36 {strides = array<i32>} : memref<16x128xbf16, #tpu.memory_space<vmem>>, vector<16x128xbf16>,
    return
  }
  func.func @transform_0(%arg0: i32) -> (i32, i32) {
    %c0_i32 = arith.constant 0 : i32
    %c0_i32_0 = arith.constant 0 : i32
    return %arg0, %c0_i32 : i32, i32
  }
  func.func @transform_1(%arg0: i32) -> (i32, i32) {
    %c0_i32 = arith.constant 0 : i32
    %c0_i32_0 = arith.constant 0 : i32
    %c0_i32_1 = arith.constant 0 : i32
    return %c0_i32, %c0_i32_0 : i32, i32
  }
  func.func @transform_2(%arg0: i32) -> (i32, i32) {
    %c0_i32 = arith.constant 0 : i32
    %c0_i32_0 = arith.constant 0 : i32
    %c0_i32_1 = arith.constant 0 : i32
    return %c0_i32, %c0_i32_0 : i32, i32
  }
  func.func @transform_3(%arg0: i32) -> (i32, i32) {
    %c0_i32 = arith.constant 0 : i32
    %c0_i32_0 = arith.constant 0 : i32
    %c0_i32_1 = arith.constant 0 : i32
    return %c0_i32, %c0_i32_0 : i32, i32
  }
  func.func @transform_4(%arg0: i32) -> (i32, i32) {
    %c0_i32 = arith.constant 0 : i32
    %c0_i32_0 = arith.constant 0 : i32
    %c0_i32_1 = arith.constant 0 : i32
    return %c0_i32, %c0_i32_0 : i32, i32
  }
  func.func @transform_5(%arg0: i32) -> (i32, i32) {
    %c0_i32 = arith.constant 0 : i32
    %c0_i32_0 = arith.constant 0 : i32
    %c0_i32_1 = arith.constant 0 : i32
    return %c0_i32, %c0_i32_0 : i32, i32
  }
  func.func @transform_6(%arg0: i32) -> (i32, i32) {
    %c0_i32 = arith.constant 0 : i32
    %c0_i32_0 = arith.constant 0 : i32
    %c0_i32_1 = arith.constant 0 : i32
    return %c0_i32, %c0_i32_0 : i32, i32
  }
  func.func @transform_7(%arg0: i32) -> (i32, i32) {
    %c0_i32 = arith.constant 0 : i32
    %c0_i32_0 = arith.constant 0 : i32
    %c0_i32_1 = arith.constant 0 : i32
    return %c0_i32, %c0_i32_0 : i32, i32
  }
  func.func @transform_8(%arg0: i32) -> (i32, i32) {
    %c0_i32 = arith.constant 0 : i32
    %c0_i32_0 = arith.constant 0 : i32
    %c0_i32_1 = arith.constant 0 : i32
    return %c0_i32, %c0_i32_0 : i32, i32
  }
  func.func @transform_9(%arg0: i32) -> (i32, i32) {
    %c0_i32 = arith.constant 0 : i32
    %c0_i32_0 = arith.constant 0 : i32
    return %arg0, %c0_i32 : i32, i32
  }
}

</mosaic_0001>

<bundles_post_ra>
// kernel: tpu_custom_call.1
= control target key start
LH: loop header
LB: loop body
LE: loop exit
PB: predicated region body
PF: predicated region fallthrough
CT: control target
= control target key end

     0   :  { %14 = vsyncpa [#allocation3], 0  ;;  %s4352_s0 = inlined_call_operand.hbm [shape: f32[16,784], index: 0, kind: input, shape index: {}]   ;;  %s4353_s1 = inlined_call_operand.hbm [shape: bf16[784,512], index: 1, kind: input, shape index: {}]   ;;  %s4354_s2 = inlined_call_operand.hbm [shape: f32[1,512], index: 2, kind: input, shape index: {}]   ;;  %s4355_s3 = inlined_call_operand.hbm [shape: bf16[512,256], index: 3, kind: input, shape index: {}]   ;;  %s4356_s4 = inlined_call_operand.vmem [shape: f32[1,256], index: 4, kind: input, shape index: {}]   ;;  %s4357_s5 = inlined_call_operand.hbm [shape: bf16[256,128], index: 5, kind: input, shape index: {}]   ;;  %s4358_s6 = inlined_call_operand.vmem [shape: f32[1,128], index: 6, kind: input, shape index: {}]   ;;  %s4359_s7 = inlined_call_operand.hbm [shape: bf16[128,128], index: 7, kind: input, shape index: {}]   ;;  %s4360_s8 = inlined_call_operand.vmem [shape: f32[1,128], index: 8, kind: input, shape index: {}]   ;;  %s4361_s9 = inlined_call_operand.hbm [shape: bf16[16,128], index: 9, kind: output, shape index: {}]  }
   0x1   :  { %15 = vsyncpa [#allocation6], 0 }
   0x2   :  { %16 = vsyncpa [#allocation9], 0 }
   0x3   :  { %17 = vsyncpa [#allocation12], 0  ;;  %s36_s11 = sshll.u32 %s4353_s1, 4  ;;  %s37_s11 = int_to_ptr.hbm [resolvable:$true] %s36_s11 }
   0x4   :  { %18 = vsyncpa [#allocation4], 0  ;;  %s4192_s12 = smov [#allocation5]   ;;  %s60_s16 = sshll.u32 %s4355_s3, 4  ;;  %s61_s16 = int_to_ptr.hbm [resolvable:$true] %s60_s16 }
   0x5   :  { %s38_s13 = sshll.u32 %s4192_s12, 4  ;;  %s4193_s17 = smov 256   ;;  %s39_s13 = int_to_ptr.vmem [resolvable:$true] %s38_s13 }
   0x6   :  { %s4194_s18 = smov 16   ;;  %s4195_s19 = smov [#allocation8]  }
   0x7   :  { %44 = dma.hbm_to_vmem [thread:$0]  %s37_s11, 25088, %s39_s13, [#allocation6], %s4193_s17, %s4193_s17, %s4194_s18  }
   0x8   :  { %s62_s20 = sshll.u32 %s4195_s19, 4  ;;  %s4196_s21 = smov 128   ;;  %s63_s20 = int_to_ptr.vmem [resolvable:$true] %s62_s20 }
   0x9   :  { %s4197_s22 = smov 8   ;;  %s23_s24 = sshll.u32 %s4352_s0, 4  ;;  %s24_s24 = int_to_ptr.hbm [resolvable:$true] %s23_s24 }
   0xa   :  { %68 = dma.hbm_to_vmem [thread:$0]  %s61_s16, 8192, %s63_s20, [#allocation9], %s4196_s21, %s4196_s21, %s4197_s22  }
   0xb   :  { %s4198_s25 = smov [#allocation2]   ;;  %s50_s28 = sshll.u32 %s4354_s2, 4  ;;  %s51_s28 = int_to_ptr.hbm [resolvable:$true] %s50_s28 }
   0xc   :  { %s25_s26 = sshll.u32 %s4198_s25, 4  ;;  %s4199_s29 = smov 896   ;;  %s26_s26 = int_to_ptr.vmem [resolvable:$true] %s25_s26 }
   0xd   :  { %s4200_s30 = smov 56   ;;  %s4201_s10 = smov [#allocation7]  }
   0xe   :  { %31 = dma.hbm_to_vmem [thread:$0]  %s24_s24, 1792, %s26_s26, [#allocation3], %s4199_s29, %s4199_s29, %s4200_s30  }
   0xf   :  { %s52_s11 = sshll.u32 %s4201_s10, 4  ;;  %s75_s14 = sshll.u32 %s4357_s5, 4  ;;  %s53_s11 = int_to_ptr.vmem [resolvable:$true] %s52_s11  ;;  %s76_s14 = int_to_ptr.hbm [resolvable:$true] %s75_s14 }
  0x10   :  { %55 = dma.hbm_to_vmem [thread:$0]  %s51_s28, 64, %s53_s11, [#allocation6]  }
  0x11   :  { %s4202_s0 = smov [#allocation10]   ;;  %s90_s2 = sshll.u32 %s4359_s7, 4  ;;  %s91_s2 = int_to_ptr.hbm [resolvable:$true] %s90_s2 }
  0x12   :  { %s77_s15 = sshll.u32 %s4202_s0, 4  ;;  %s4203_s18 = smov 64   ;;  %s78_s15 = int_to_ptr.vmem [resolvable:$true] %s77_s15 }
  0x13   :  { %s4204_s19 = smov 4   ;;  %s4205_s20 = smov [#allocation11]  }
  0x14   :  { %83 = dma.hbm_to_vmem [thread:$0]  %s76_s14, 2048, %s78_s15, [#allocation9], %s4203_s18, %s4203_s18, %s4204_s19  }
  0x15   :  { %s92_s21 = sshll.u32 %s4205_s20, 4  ;;  %s93_s21 = int_to_ptr.vmem [resolvable:$true] %s92_s21 }
  0x16   :  { %98 = dma.hbm_to_vmem [thread:$0]  %s91_s2, 1024, %s93_s21, [#allocation12], %s4203_s18, %s4203_s18, %s4204_s19  }
  0x17   :  { %4182 = dma.done.wait [#allocation3], 1792  }
  0x18   :  { %4183 = vsyncadd [#allocation3], 4294965504 }
  0x19   :  { %4184 = dma.done.wait [#allocation6], 25152  }
  0x1a   :  { %4185 = vsyncadd [#allocation6], 4294942144 }
  0x1b   :  { %4186 = dma.done.wait [#allocation9], 10240  }
  0x1c   :  { %4187 = vsyncadd [#allocation9], 4294957056 }
  0x1d   :  { %4188 = dma.done.wait [#allocation12], 1024  }
  0x1e   :  { %4189 = vsyncadd [#allocation12], 4294966272  ;;  %v2672_v0 = vld [vmem:[#allocation5 + $0xe0] sm:$0xf]  ;;  %v3730_v1 = vld [vmem:[#allocation5 + $0xec] sm:$0xf0] }
  0x1f   :  { %v2800_v2 = vld [vmem:[#allocation5 + $0x1e0] sm:$0xf]  ;;  %v2673_v3 = vor.u32 %v3730_v1, %v2672_v0  ;;  %v3762_v4 = vld [vmem:[#allocation5 + $0x1ec] sm:$0xf0]  ;;  %vm1333_vm0 = vcmask 130048   ;;  %s2542_s26 = sshll.u32 %s4361_s9, 4  ;;  %s2543_s26 = int_to_ptr.hbm [resolvable:$true] %s2542_s26 }
  0x20   :  { %v2928_v5 = vld [vmem:[#allocation5 + $0x2e0] sm:$0xf]  ;;  %v3794_v6 = vld [vmem:[#allocation5 + $0x2ec] sm:$0xf0]  ;;  %v2801_v7 = vor.u32 %v3762_v4, %v2800_v2 }
  0x21   :  { %v2929_v8 = vor.u32 %v3794_v6, %v2928_v5  ;;  %v3056_v9 = vld [vmem:[#allocation5 + $0x3e0] sm:$0xf]  ;;  %v3826_v10 = vld [vmem:[#allocation5 + $0x3ec] sm:$0xf0]  ;;  %1337 = vmatpush.bf16.msra.mxu0 %v2673_v3 }
  0x22   :  { %v2656_v11 = vld [vmem:[#allocation5 + $0xc0] sm:$0xf]  ;;  %v3057_v12 = vor.u32 %v3826_v10, %v3056_v9  ;;  %v3726_v13 = vld [vmem:[#allocation5 + $0xcc] sm:$0xf0]  ;;  %1351 = vmatpush.bf16.msra.mxu1 %v2801_v7 }
  0x23   :  { %v2784_v14 = vld [vmem:[#allocation5 + $0x1c0] sm:$0xf]  ;;  %v3758_v15 = vld [vmem:[#allocation5 + $0x1cc] sm:$0xf0]  ;;  %1365 = vmatpush.bf16.msra.mxu2 %v2929_v8  ;;  %v2657_v16 = vor.u32 %v3726_v13, %v2656_v11 }
  0x24   :  { %v2785_v17 = vor.u32 %v3758_v15, %v2784_v14  ;;  %v2912_v18 = vld [vmem:[#allocation5 + $0x2c0] sm:$0xf]  ;;  %v3790_v19 = vld [vmem:[#allocation5 + $0x2cc] sm:$0xf0]  ;;  %1379 = vmatpush.bf16.msra.mxu3 %v3057_v12 }
  0x25   :  { %v3040_v20 = vld [vmem:[#allocation5 + $0x3c0] sm:$0xf]  ;;  %v2913_v21 = vor.u32 %v3790_v19, %v2912_v18  ;;  %v3822_v22 = vld [vmem:[#allocation5 + $0x3cc] sm:$0xf0]  ;;  %1338 = vmatpush.bf16.msra.mxu0 %v2657_v16 }
  0x26   :  { %v2640_v23 = vld [vmem:[#allocation5 + $0xa0] sm:$0xf]  ;;  %v3722_v24 = vld [vmem:[#allocation5 + $0xac] sm:$0xf0]  ;;  %v3041_v25 = vor.u32 %v3822_v22, %v3040_v20  ;;  %1352 = vmatpush.bf16.msra.mxu1 %v2785_v17 }
  0x27   :  { %v2768_v26 = vld [vmem:[#allocation5 + $0x1a0] sm:$0xf]  ;;  %v3754_v27 = vld [vmem:[#allocation5 + $0x1ac] sm:$0xf0]  ;;  %v2641_v29 = vor.u32 %v3722_v24, %v2640_v23  ;;  %1366 = vmatpush.bf16.msra.mxu2 %v2913_v21 }
  0x28   :  { %v2896_v28 = vld [vmem:[#allocation5 + $0x2a0] sm:$0xf]  ;;  %v3786_v30 = vld [vmem:[#allocation5 + $0x2ac] sm:$0xf0]  ;;  %v2769_v33 = vor.u32 %v3754_v27, %v2768_v26  ;;  %1380 = vmatpush.bf16.msra.mxu3 %v3041_v25 }
  0x29   :  { %v3024_v31 = vld [vmem:[#allocation5 + $0x3a0] sm:$0xf]  ;;  %v3818_v32 = vld [vmem:[#allocation5 + $0x3ac] sm:$0xf0]  ;;  %v2897_v34 = vor.u32 %v3786_v30, %v2896_v28  ;;  %1339 = vmatpush.bf16.msra.mxu0 %v2641_v29 }
  0x2a   :  { %v2624_v35 = vld [vmem:[#allocation5 + $0x80] sm:$0xf]  ;;  %v3718_v36 = vld [vmem:[#allocation5 + $0x8c] sm:$0xf0]  ;;  %v3025_v38 = vor.u32 %v3818_v32, %v3024_v31  ;;  %1353 = vmatpush.bf16.msra.mxu1 %v2769_v33  ;;  %v3728_v32 = vld [vmem:[#allocation5 + $0xe4] sm:$0xf] }
  0x2b   :  { %v2752_v37 = vld [vmem:[#allocation5 + $0x180] sm:$0xf]  ;;  %v3750_v39 = vld [vmem:[#allocation5 + $0x18c] sm:$0xf0]  ;;  %v2625_v44 = vor.u32 %v3718_v36, %v2624_v35  ;;  %1367 = vmatpush.bf16.msra.mxu2 %v2897_v34  ;;  %v2674_v33 = vld [vmem:[#allocation5 + $0xf0] sm:$0xf0] }
  0x2c   :  { %v2880_v40 = vld [vmem:[#allocation5 + $0x280] sm:$0xf]  ;;  %v3782_v41 = vld [vmem:[#allocation5 + $0x28c] sm:$0xf0]  ;;  %v2753_v45 = vor.u32 %v3750_v39, %v2752_v37  ;;  %1381 = vmatpush.bf16.msra.mxu3 %v3025_v38  ;;  %v135_v36 = vld [vmem:[#allocation2 + $0x48] sm:$0xff] }
  0x2d   :  { %v3008_v42 = vld [vmem:[#allocation5 + $0x380] sm:$0xf]  ;;  %v3814_v43 = vld [vmem:[#allocation5 + $0x38c] sm:$0xf0]  ;;  %v2881_v46 = vor.u32 %v3782_v41, %v2880_v40  ;;  %1340 = vmatpush.bf16.msra.mxu0 %v2625_v44  ;;  %v3760_v41 = vld [vmem:[#allocation5 + $0x1e4] sm:$0xf] }
  0x2e   :  { %v2608_v47 = vld [vmem:[#allocation5 + $0x60] sm:$0xf]  ;;  %v3714_v48 = vld [vmem:[#allocation5 + $0x6c] sm:$0xf0]  ;;  %v3009_v50 = vor.u32 %v3814_v43, %v3008_v42  ;;  %1354 = vmatpush.bf16.msra.mxu1 %v2753_v45  ;;  %v133_v43 = vld [vmem:[#allocation2 + $0x38] sm:$0xff] }
  0x2f   :  { %v2736_v49 = vld [vmem:[#allocation5 + $0x160] sm:$0xf]  ;;  %v3746_v51 = vld [vmem:[#allocation5 + $0x16c] sm:$0xf0]  ;;  %v2609_v56 = vor.u32 %v3714_v48, %v2608_v47  ;;  %1368 = vmatpush.bf16.msra.mxu2 %v2881_v46  ;;  %v2802_v46 = vld [vmem:[#allocation5 + $0x1f0] sm:$0xf0] }
  0x30   :  { %v2864_v52 = vld [vmem:[#allocation5 + $0x260] sm:$0xf]  ;;  %v3778_v53 = vld [vmem:[#allocation5 + $0x26c] sm:$0xf0]  ;;  %v2737_v57 = vor.u32 %v3746_v51, %v2736_v49  ;;  %1382 = vmatpush.bf16.msra.mxu3 %v3009_v50  ;;  %v129_v47 = vld [vmem:[#allocation2 + $0x18] sm:$0xff]  ;;  %v2677_v50 = vor.u32 %v3728_v32, %v2674_v33 }
  0x31   :  { %v2992_v54 = vld [vmem:[#allocation5 + $0x360] sm:$0xf]  ;;  %v3810_v55 = vld [vmem:[#allocation5 + $0x36c] sm:$0xf0]  ;;  %v2865_v58 = vor.u32 %v3778_v53, %v2864_v52  ;;  %1341 = vmatpush.bf16.msra.mxu0 %v2609_v56 }
  0x32   :  { %v2592_v59 = vld [vmem:[#allocation5 + $0x40] sm:$0xf]  ;;  %v3710_v60 = vld [vmem:[#allocation5 + $0x4c] sm:$0xf0]  ;;  %v2993_v62 = vor.u32 %v3810_v55, %v2992_v54  ;;  %1355 = vmatpush.bf16.msra.mxu1 %v2737_v57  ;;  %v3724_v57 = vld [vmem:[#allocation5 + $0xc4] sm:$0xf] }
  0x33   :  { %v2720_v61 = vld [vmem:[#allocation5 + $0x140] sm:$0xf]  ;;  %v3742_v63 = vld [vmem:[#allocation5 + $0x14c] sm:$0xf0]  ;;  %v2593_v4 = vor.u32 %v3710_v60, %v2592_v59  ;;  %1369 = vmatpush.bf16.msra.mxu2 %v2865_v58  ;;  %v2658_v58 = vld [vmem:[#allocation5 + $0xd0] sm:$0xf0] }
  0x34   :  { %v2848_v0 = vld [vmem:[#allocation5 + $0x240] sm:$0xf]  ;;  %v3774_v1 = vld [vmem:[#allocation5 + $0x24c] sm:$0xf0]  ;;  %v2721_v6 = vor.u32 %v3742_v63, %v2720_v61  ;;  %1383 = vmatpush.bf16.msra.mxu3 %v2993_v62  ;;  %v127_v61 = vld [vmem:[#allocation2 + $0x8] sm:$0xff]  ;;  %v2805_v63 = vor.u32 %v3760_v41, %v2802_v46 }
  0x35   :  { %v2976_v2 = vld [vmem:[#allocation5 + $0x340] sm:$0xf]  ;;  %v3806_v3 = vld [vmem:[#allocation5 + $0x34c] sm:$0xf0]  ;;  %v2849_v7 = vor.u32 %v3774_v1, %v2848_v0  ;;  %1342 = vmatpush.bf16.msra.mxu0 %v2593_v4  ;;  %v3756_v1 = vld [vmem:[#allocation5 + $0x1c4] sm:$0xf]  ;;  %v2661_v4 = vor.u32 %v3724_v57, %v2658_v58 }
  0x36   :  { %v2576_v5 = vld [vmem:[#allocation5 + $0x20] sm:$0xf]  ;;  %v3706_v8 = vld [vmem:[#allocation5 + $0x2c] sm:$0xf0]  ;;  %v2977_v11 = vor.u32 %v3806_v3, %v2976_v2  ;;  %1356 = vmatpush.bf16.msra.mxu1 %v2721_v6  ;;  %v2786_v2 = vld [vmem:[#allocation5 + $0x1d0] sm:$0xf0] }
  0x37   :  { %v2704_v9 = vld [vmem:[#allocation5 + $0x120] sm:$0xf]  ;;  %v3738_v10 = vld [vmem:[#allocation5 + $0x12c] sm:$0xf0]  ;;  %v2577_v18 = vor.u32 %v3706_v8, %v2576_v5  ;;  %1370 = vmatpush.bf16.msra.mxu2 %v2849_v7  ;;  %v2738_v41 = vld [vmem:[#allocation5 + $0x170] sm:$0xf0] }
  0x38   :  { %v2832_v12 = vld [vmem:[#allocation5 + $0x220] sm:$0xf]  ;;  %v3770_v13 = vld [vmem:[#allocation5 + $0x22c] sm:$0xf0]  ;;  %v2705_v23 = vor.u32 %v3738_v10, %v2704_v9  ;;  %1384 = vmatpush.bf16.msra.mxu3 %v2977_v11  ;;  %v3720_v10 = vld [vmem:[#allocation5 + $0xa4] sm:$0xf] }
  0x39   :  { %v2960_v14 = vld [vmem:[#allocation5 + $0x320] sm:$0xf]  ;;  %v3802_v15 = vld [vmem:[#allocation5 + $0x32c] sm:$0xf0]  ;;  %v2833_v24 = vor.u32 %v3770_v13, %v2832_v12  ;;  %1343 = vmatpush.bf16.msra.mxu0 %v2577_v18  ;;  %v2642_v11 = vld [vmem:[#allocation5 + $0xb0] sm:$0xf0]  ;;  %v2789_v12 = vor.u32 %v3756_v1, %v2786_v2 }
  0x3a   :  { %v2560_v16 = vld [vmem:[#allocation5] sm:$0xf]  ;;  %v3702_v17 = vld [vmem:[#allocation5 + $0xc] sm:$0xf0]  ;;  %v2961_v28 = vor.u32 %v3802_v15, %v2960_v14  ;;  %1357 = vmatpush.bf16.msra.mxu1 %v2705_v23  ;;  %v3752_v14 = vld [vmem:[#allocation5 + $0x1a4] sm:$0xf] }
  0x3b   :  { %v2688_v19 = vld [vmem:[#allocation5 + $0x100] sm:$0xf]  ;;  %v3734_v20 = vld [vmem:[#allocation5 + $0x10c] sm:$0xf0]  ;;  %v2561_v35 = vor.u32 %v3702_v17, %v2560_v16  ;;  %1371 = vmatpush.bf16.msra.mxu2 %v2833_v24  ;;  %v2770_v15 = vld [vmem:[#allocation5 + $0x1b0] sm:$0xf0]  ;;  %v2645_v17 = vor.u32 %v3720_v10, %v2642_v11 }
  0x3c   :  { %v2816_v21 = vld [vmem:[#allocation5 + $0x200] sm:$0xf]  ;;  %v3766_v22 = vld [vmem:[#allocation5 + $0x20c] sm:$0xf0]  ;;  %v2689_v39 = vor.u32 %v3734_v20, %v2688_v19  ;;  %1385 = vmatpush.bf16.msra.mxu3 %v2961_v28  ;;  %v2626_v23 = vld [vmem:[#allocation5 + $0x90] sm:$0xf0]  ;;  %v2773_v24 = vor.u32 %v3752_v14, %v2770_v15 }
  0x3d   :  { %v2944_v25 = vld [vmem:[#allocation5 + $0x300] sm:$0xf]  ;;  %v3798_v26 = vld [vmem:[#allocation5 + $0x30c] sm:$0xf0]  ;;  %v2817_v40 = vor.u32 %v3766_v22, %v2816_v21  ;;  %1344 = vmatpush.bf16.msra.mxu0 %v2561_v35  ;;  %v3716_v22 = vld [vmem:[#allocation5 + $0x84] sm:$0xf] }
  0x3e   :  { %v3184_v27 = vld [vmem:[#allocation5 + $0x4e0] sm:$0xf]  ;;  %v3858_v29 = vld [vmem:[#allocation5 + $0x4ec] sm:$0xf0]  ;;  %v2945_v44 = vor.u32 %v3798_v26, %v2944_v25  ;;  %1358 = vmatpush.bf16.msra.mxu1 %v2689_v39  ;;  %v3748_v26 = vld [vmem:[#allocation5 + $0x184] sm:$0xf] }
  0x3f   :  { %v3312_v30 = vld [vmem:[#allocation5 + $0x5e0] sm:$0xf]  ;;  %v3890_v31 = vld [vmem:[#allocation5 + $0x5ec] sm:$0xf0]  ;;  %v3185_v45 = vor.u32 %v3858_v29, %v3184_v27  ;;  %1372 = vmatpush.bf16.msra.mxu2 %v2817_v40  ;;  %v2754_v27 = vld [vmem:[#allocation5 + $0x190] sm:$0xf0]  ;;  %v2629_v29 = vor.u32 %v3716_v22, %v2626_v23 }
  0x40   :  { %v128_v34 = vld [vmem:[#allocation2 + $0x10] sm:$0xff]  ;;  %v3894_v38 = vld [vmem:[#allocation5 + $0x60c] sm:$0xf0]  ;;  %v3313_v49 = vor.u32 %v3890_v31, %v3312_v30  ;;  %1386 = vmatpush.bf16.msra.mxu3 %v2945_v44  ;;  %v2610_v35 = vld [vmem:[#allocation5 + $0x70] sm:$0xf0] }
  0x41   :  { %v3328_v37 = vld [vmem:[#allocation5 + $0x600] sm:$0xf]  ;;  %v126_v42 = vld [vmem:[#allocation2] sm:$0xff]  ;;  %v4281_v54 = vpack.c.bf16 %v135_v36, %v128_v34  ;;  %1393 = vmatpush.bf16.msrb.mxu0 %v3185_v45  ;;  %v3712_v34 = vld [vmem:[#allocation5 + $0x64] sm:$0xf] }
  0x42   :  { %v136_v48 = vld [vmem:[#allocation2 + $0x50] sm:$0xff]  ;;  %v3854_v52 = vld [vmem:[#allocation5 + $0x4cc] sm:$0xf0]  ;;  %v4283_v55 = vpack.c.bf16 %v133_v43, %v126_v42  ;;  %v3329_v59 = vor.u32 %v3894_v38, %v3328_v37  ;;  %1407 = vmatpush.bf16.msrb.mxu1 %v3313_v49  ;;  %v139_v37 = vld [vmem:[#allocation2 + $0x68] sm:$0xff]  ;;  %v2757_v38 = vor.u32 %v3748_v26, %v2754_v27  ;;  %v2613_v43 = vor.u32 %v3712_v34, %v2610_v35 }
  0x43   :  { %v3168_v51 = vld [vmem:[#allocation5 + $0x4c0] sm:$0xf]  ;;  %v3886_v56 = vld [vmem:[#allocation5 + $0x5cc] sm:$0xf0]  ;;  %v4285_v60 = vpack.c.bf16 %v136_v48, %v129_v47  ;;  %1373 = vmatmul.bf16.vlgmr.msra.gmra.mxu2 %v4281_v54  ;;  %v3744_v40 = vld [vmem:[#allocation5 + $0x164] sm:$0xf] }
  0x44   :  { %v3296_v53 = vld [vmem:[#allocation5 + $0x5c0] sm:$0xf]  ;;  %v134_v62 = vld [vmem:[#allocation2 + $0x40] sm:$0xff]  ;;  %v3169_v0 = vor.u32 %v3854_v52, %v3168_v51  ;;  %1435 = vmatpush.bf16.msrb.mxu3 %v2677_v50  ;;  %1345 = vmatmul.bf16.vlgmr.msra.gmra.mxu0 %v4283_v55  ;;  %v3708_v48 = vld [vmem:[#allocation5 + $0x44] sm:$0xf]  ;;  %v2741_v51 = vor.u32 %v3744_v40, %v2738_v41 }
  0x45   :  { %v3297_v3 = vor.u32 %v3886_v56, %v3296_v53  ;;  %v3152_v5 = vld [vmem:[#allocation5 + $0x4a0] sm:$0xf]  ;;  %v3850_v6 = vld [vmem:[#allocation5 + $0x4ac] sm:$0xf0]  ;;  %v4289_v8 = vpack.c.bf16 %v134_v62, %v127_v61  ;;  %1428 = vmatpush.bf16.msrb.mxu2 %v3329_v59  ;;  %1387 = vmatmul.bf16.vlgmr.msra.gmra.mxu3 %v4285_v60  ;;  %v2594_v49 = vld [vmem:[#allocation5 + $0x50] sm:$0xf0] }
  0x46   :  { %v3280_v7 = vld [vmem:[#allocation5 + $0x5a0] sm:$0xf]  ;;  %v3882_v9 = vld [vmem:[#allocation5 + $0x5ac] sm:$0xf0]  ;;  %1394 = vmatpush.bf16.msrb.mxu0 %v3169_v0  ;;  %v3153_v13 = vor.u32 %v3850_v6, %v3152_v5  ;;  %v3740_v53 = vld [vmem:[#allocation5 + $0x144] sm:$0xf]  ;;  %v2597_v58 = vor.u32 %v3708_v48, %v2594_v49 }
  0x47   :  { %1408 = vmatpush.bf16.msrb.mxu1 %v3297_v3  ;;  %v3281_v16 = vor.u32 %v3882_v9, %v3280_v7  ;;  %v3136_v18 = vld [vmem:[#allocation5 + $0x480] sm:$0xf]  ;;  %v3846_v19 = vld [vmem:[#allocation5 + $0x48c] sm:$0xf0]  ;;  %v2722_v56 = vld [vmem:[#allocation5 + $0x150] sm:$0xf0] }
  0x48   :  { %1436 = vmatpush.bf16.msrb.mxu3 %v2661_v4  ;;  %v3264_v20 = vld [vmem:[#allocation5 + $0x580] sm:$0xf]  ;;  %1359 = vmatmul.bf16.vlgmr.msra.gmra.mxu1 %v4289_v8  ;;  %v3878_v21 = vld [vmem:[#allocation5 + $0x58c] sm:$0xf0]  ;;  %v3137_v25 = vor.u32 %v3846_v19, %v3136_v18  ;;  %v3704_v0 = vld [vmem:[#allocation5 + $0x24] sm:$0xf]  ;;  %v2725_v4 = vor.u32 %v3740_v53, %v2722_v56 }
  0x49   :  { %1449 = vmatpush.bf16.msra.mxu2 %v2805_v63  ;;  %v3265_v28 = vor.u32 %v3878_v21, %v3264_v20  ;;  %v3120_v30 = vld [vmem:[#allocation5 + $0x460] sm:$0xf]  ;;  %v3842_v31 = vld [vmem:[#allocation5 + $0x46c] sm:$0xf0]  ;;  %v2578_v1 = vld [vmem:[#allocation5 + $0x30] sm:$0xf0] }
  0x4a   :  { %1395 = vmatpush.bf16.msrb.mxu0 %v3153_v13  ;;  %v3248_v32 = vld [vmem:[#allocation5 + $0x560] sm:$0xf]  ;;  %v3874_v33 = vld [vmem:[#allocation5 + $0x56c] sm:$0xf0]  ;;  %v3121_v39 = vor.u32 %v3842_v31, %v3120_v30  ;;  %v3736_v2 = vld [vmem:[#allocation5 + $0x124] sm:$0xf]  ;;  %v2581_v11 = vor.u32 %v3704_v0, %v2578_v1 }
  0x4b   :  { %1409 = vmatpush.bf16.msrb.mxu1 %v3281_v16  ;;  %v132_v36 = vld [vmem:[#allocation2 + $0x30] sm:$0xff]  ;;  %v3249_v42 = vor.u32 %v3874_v33, %v3248_v32  ;;  %v3838_v45 = vld [vmem:[#allocation5 + $0x44c] sm:$0xf0]  ;;  %v2706_v3 = vld [vmem:[#allocation5 + $0x130] sm:$0xf0] }
  0x4c   :  { %1437 = vmatpush.bf16.msrb.mxu3 %v2645_v17  ;;  %v3104_v44 = vld [vmem:[#allocation5 + $0x440] sm:$0xf]  ;;  %v3870_v47 = vld [vmem:[#allocation5 + $0x54c] sm:$0xf0]  ;;  %v4293_v50 = vpack.c.bf16 %v139_v37, %v132_v36  ;;  %v3700_v13 = vld [vmem:[#allocation5 + $0x4] sm:$0xf]  ;;  %v2709_v21 = vor.u32 %v3736_v2, %v2706_v3 }
  0x4d   :  { %1450 = vmatpush.bf16.msra.mxu2 %v2789_v12  ;;  %v3232_v46 = vld [vmem:[#allocation5 + $0x540] sm:$0xf]  ;;  %v3105_v52 = vor.u32 %v3838_v45, %v3104_v44  ;;  %v3834_v61 = vld [vmem:[#allocation5 + $0x42c] sm:$0xf0]  ;;  %v2562_v14 = vld [vmem:[#allocation5 + $0x10] sm:$0xf0] }
  0x4e   :  { %1396 = vmatpush.bf16.msrb.mxu0 %v3137_v25  ;;  %v3233_v57 = vor.u32 %v3870_v47, %v3232_v46  ;;  %v3088_v59 = vld [vmem:[#allocation5 + $0x420] sm:$0xf]  ;;  %v3866_v63 = vld [vmem:[#allocation5 + $0x52c] sm:$0xf0]  ;;  %v3792_v15 = vld [vmem:[#allocation5 + $0x2e4] sm:$0xf]  ;;  %v2565_v27 = vor.u32 %v3700_v13, %v2562_v14 }
  0x4f   :  { %1410 = vmatpush.bf16.msrb.mxu1 %v3265_v28  ;;  %v3216_v62 = vld [vmem:[#allocation5 + $0x520] sm:$0xf]  ;;  %v3089_v5 = vor.u32 %v3834_v61, %v3088_v59  ;;  %v3830_v7 = vld [vmem:[#allocation5 + $0x40c] sm:$0xf0]  ;;  %v2930_v16 = vld [vmem:[#allocation5 + $0x2f0] sm:$0xf0] }
  0x50   :  { %1438 = vmatpush.bf16.msrb.mxu3 %v2629_v29  ;;  %v3072_v6 = vld [vmem:[#allocation5 + $0x400] sm:$0xf]  ;;  %v3217_v10 = vor.u32 %v3866_v63, %v3216_v62  ;;  %v3862_v12 = vld [vmem:[#allocation5 + $0x50c] sm:$0xf0]  ;;  %v3824_v17 = vld [vmem:[#allocation5 + $0x3e4] sm:$0xf]  ;;  %v2933_v31 = vor.u32 %v3792_v15, %v2930_v16 }
  0x51   :  { %1451 = vmatpush.bf16.msra.mxu2 %v2773_v24  ;;  %v3200_v9 = vld [vmem:[#allocation5 + $0x500] sm:$0xf]  ;;  %v3058_v18 = vld [vmem:[#allocation5 + $0x3f0] sm:$0xf0]  ;;  %v3856_v19 = vld [vmem:[#allocation5 + $0x4e4] sm:$0xf]  ;;  %v3073_v22 = vor.u32 %v3830_v7, %v3072_v6 }
  0x52   :  { %1397 = vmatpush.bf16.msrb.mxu0 %v3121_v39  ;;  %v3186_v20 = vld [vmem:[#allocation5 + $0x4f0] sm:$0xf0]  ;;  %v137_v24 = vld [vmem:[#allocation2 + $0x58] sm:$0xff]  ;;  %v3732_v25 = vld [vmem:[#allocation5 + $0x104] sm:$0xf]  ;;  %v3201_v26 = vor.u32 %v3862_v12, %v3200_v9  ;;  %v3061_v32 = vor.u32 %v3824_v17, %v3058_v18 }
  0x53   :  { %1411 = vmatpush.bf16.msrb.mxu1 %v3249_v42  ;;  %3342 = vmatmul.msk.bf16.vlgmr.msrb.gmra.mxu2 %vm1333_vm0, %v4293_v50  ;;  %v130_v23 = vld [vmem:[#allocation2 + $0x20] sm:$0xff]  ;;  %v131_v29 = vld [vmem:[#allocation2 + $0x28] sm:$0xff]  ;;  %v3888_v33 = vld [vmem:[#allocation5 + $0x5e4] sm:$0xf]  ;;  %v3189_v36 = vor.u32 %v3856_v19, %v3186_v20 }
  0x54   :  { %1439 = vmatpush.bf16.msrb.mxu3 %v2613_v43  ;;  %v2690_v28 = vld [vmem:[#allocation5 + $0x110] sm:$0xf0]  ;;  %v3788_v35 = vld [vmem:[#allocation5 + $0x2c4] sm:$0xf]  ;;  %v4297_v37 = vpack.c.bf16 %v137_v24, %v130_v23 }
  0x55   :  { %1452 = vmatpush.bf16.msra.mxu2 %v2757_v38  ;;  %v138_v30 = vld [vmem:[#allocation2 + $0x60] sm:$0xff]  ;;  %v3820_v39 = vld [vmem:[#allocation5 + $0x3c4] sm:$0xf]  ;;  %v2693_v41 = vor.u32 %v3732_v25, %v2690_v28 }
  0x56   :  { %1398 = vmatpush.bf16.msrb.mxu0 %v3105_v52  ;;  %v3314_v34 = vld [vmem:[#allocation5 + $0x5f0] sm:$0xf0]  ;;  %v4299_v42 = vpack.c.bf16 %v138_v30, %v131_v29  ;;  %v3852_v43 = vld [vmem:[#allocation5 + $0x4c4] sm:$0xf] }
  0x57   :  { %1412 = vmatpush.bf16.msrb.mxu1 %v3233_v57  ;;  %v2914_v38 = vld [vmem:[#allocation5 + $0x2d0] sm:$0xf0]  ;;  %v3317_v45 = vor.u32 %v3888_v33, %v3314_v34  ;;  %v3884_v48 = vld [vmem:[#allocation5 + $0x5c4] sm:$0xf] }
  0x58   :  { %1440 = vmatpush.bf16.msrb.mxu3 %v2597_v58  ;;  %v3042_v40 = vld [vmem:[#allocation5 + $0x3d0] sm:$0xf0]  ;;  %v2917_v46 = vor.u32 %v3788_v35, %v2914_v38  ;;  %v3816_v56 = vld [vmem:[#allocation5 + $0x3a4] sm:$0xf] }
  0x59   :  { %1453 = vmatpush.bf16.msra.mxu2 %v2741_v51  ;;  %v3170_v44 = vld [vmem:[#allocation5 + $0x4d0] sm:$0xf0]  ;;  %v3045_v47 = vor.u32 %v3820_v39, %v3042_v40  ;;  %v3784_v51 = vld [vmem:[#allocation5 + $0x2a4] sm:$0xf] }
  0x5a   :  { %1399 = vmatpush.bf16.msrb.mxu0 %v3089_v5  ;;  %v3298_v49 = vld [vmem:[#allocation5 + $0x5d0] sm:$0xf0]  ;;  %v3173_v52 = vor.u32 %v3852_v43, %v3170_v44  ;;  %v3848_v58 = vld [vmem:[#allocation5 + $0x4a4] sm:$0xf] }
  0x5b   :  { %1413 = vmatpush.bf16.msrb.mxu1 %v3217_v10  ;;  %v2898_v53 = vld [vmem:[#allocation5 + $0x2b0] sm:$0xf0]  ;;  %v3301_v61 = vor.u32 %v3884_v48, %v3298_v49  ;;  %v3880_v0 = vld [vmem:[#allocation5 + $0x5a4] sm:$0xf] }
  0x5c   :  { %1441 = vmatpush.bf16.msrb.mxu3 %v2581_v11  ;;  %v3026_v57 = vld [vmem:[#allocation5 + $0x3b0] sm:$0xf0]  ;;  %v2901_v62 = vor.u32 %v3784_v51, %v2898_v53  ;;  %v3780_v2 = vld [vmem:[#allocation5 + $0x284] sm:$0xf] }
  0x5d   :  { %1454 = vmatpush.bf16.msra.mxu2 %v2725_v4  ;;  %v3154_v59 = vld [vmem:[#allocation5 + $0x4b0] sm:$0xf0]  ;;  %v3029_v63 = vor.u32 %v3816_v56, %v3026_v57  ;;  %v3812_v5 = vld [vmem:[#allocation5 + $0x384] sm:$0xf] }
  0x5e   :  { %1400 = vmatpush.bf16.msrb.mxu0 %v3073_v22  ;;  %v3282_v1 = vld [vmem:[#allocation5 + $0x5b0] sm:$0xf0]  ;;  %v3157_v3 = vor.u32 %v3848_v58, %v3154_v59  ;;  %v3844_v7 = vld [vmem:[#allocation5 + $0x484] sm:$0xf] }
  0x5f   :  { %1414 = vmatpush.bf16.msrb.mxu1 %v3201_v26  ;;  %v2882_v4 = vld [vmem:[#allocation5 + $0x290] sm:$0xf0]  ;;  %v3285_v10 = vor.u32 %v3880_v0, %v3282_v1  ;;  %v3876_v13 = vld [vmem:[#allocation5 + $0x584] sm:$0xf]  ;;  %v2680_v0 = vld [vmem:[#allocation5 + $0xe8] sm:$0xf] }
  0x60   :  { %1442 = vmatpush.bf16.msrb.mxu3 %v2565_v27  ;;  %v3010_v6 = vld [vmem:[#allocation5 + $0x390] sm:$0xf0]  ;;  %v2885_v11 = vor.u32 %v3780_v2, %v2882_v4  ;;  %v3776_v15 = vld [vmem:[#allocation5 + $0x264] sm:$0xf]  ;;  %v3731_v1 = vld [vmem:[#allocation5 + $0xf4] sm:$0xf0] }
  0x61   :  { %1455 = vmatpush.bf16.msra.mxu2 %v2709_v21  ;;  %1401 = vmatmul.bf16.vlgmr.msrb.gmra.mxu0 %v4297_v37  ;;  %v3138_v9 = vld [vmem:[#allocation5 + $0x490] sm:$0xf0]  ;;  %v3013_v12 = vor.u32 %v3812_v5, %v3010_v6  ;;  %v3808_v18 = vld [vmem:[#allocation5 + $0x364] sm:$0xf]  ;;  %v2808_v2 = vld [vmem:[#allocation5 + $0x1e8] sm:$0xf] }
  0x62   :  { %1463 = vmatpush.bf16.msra.mxu0 %v2933_v31  ;;  %1415 = vmatmul.bf16.vlgmr.msrb.gmra.mxu1 %v4299_v42  ;;  %v3266_v14 = vld [vmem:[#allocation5 + $0x590] sm:$0xf0]  ;;  %v3141_v16 = vor.u32 %v3844_v7, %v3138_v9  ;;  %v3840_v20 = vld [vmem:[#allocation5 + $0x464] sm:$0xf]  ;;  %v3763_v4 = vld [vmem:[#allocation5 + $0x1f4] sm:$0xf0] }
  0x63   :  { %1477 = vmatpush.bf16.msra.mxu1 %v3061_v32  ;;  %1443 = vmatmul.bf16.vlgmr.msrb.gmra.mxu3 %v4283_v55  ;;  %v2866_v17 = vld [vmem:[#allocation5 + $0x270] sm:$0xf0]  ;;  %v3269_v22 = vor.u32 %v3876_v13, %v3266_v14  ;;  %v3872_v25 = vld [vmem:[#allocation5 + $0x564] sm:$0xf]  ;;  %v2681_v13 = vor.u32 %v3731_v1, %v2680_v0  ;;  %v2936_v14 = vld [vmem:[#allocation5 + $0x2e8] sm:$0xf] }
  0x64   :  { %1491 = vmatpush.bf16.msra.mxu3 %v3189_v36  ;;  %v2994_v19 = vld [vmem:[#allocation5 + $0x370] sm:$0xf0]  ;;  %v2869_v23 = vor.u32 %v3776_v15, %v2866_v17  ;;  %v3772_v27 = vld [vmem:[#allocation5 + $0x244] sm:$0xf]  ;;  %v3795_v15 = vld [vmem:[#allocation5 + $0x2f4] sm:$0xf0]  ;;  %v2809_v17 = vor.u32 %v3763_v4, %v2808_v2 }
  0x65   :  { %1456 = vmatpush.bf16.msra.mxu2 %v2693_v41  ;;  %v3122_v21 = vld [vmem:[#allocation5 + $0x470] sm:$0xf0]  ;;  %v2997_v24 = vor.u32 %v3808_v18, %v2994_v19  ;;  %v3804_v30 = vld [vmem:[#allocation5 + $0x344] sm:$0xf]  ;;  %v3827_v19 = vld [vmem:[#allocation5 + $0x3f4] sm:$0xf0] }
  0x66   :  { %1464 = vmatpush.bf16.msra.mxu0 %v2917_v46  ;;  %v3250_v26 = vld [vmem:[#allocation5 + $0x570] sm:$0xf0]  ;;  %v3125_v28 = vor.u32 %v3840_v20, %v3122_v21  ;;  %v3836_v32 = vld [vmem:[#allocation5 + $0x444] sm:$0xf]  ;;  %v2664_v20 = vld [vmem:[#allocation5 + $0xc8] sm:$0xf] }
  0x67   :  { %1478 = vmatpush.bf16.msra.mxu1 %v3045_v47  ;;  %v2850_v29 = vld [vmem:[#allocation5 + $0x250] sm:$0xf0]  ;;  %v3253_v34 = vor.u32 %v3872_v25, %v3250_v26  ;;  %v3868_v38 = vld [vmem:[#allocation5 + $0x544] sm:$0xf]  ;;  %v3727_v21 = vld [vmem:[#allocation5 + $0xd4] sm:$0xf0]  ;;  %v2937_v25 = vor.u32 %v3795_v15, %v2936_v14 }
  0x68   :  { %1492 = vmatpush.bf16.msra.mxu3 %v3173_v52  ;;  %1457 = vmatmul.bf16.vlgmr.msra.gmra.mxu2 %v4289_v8  ;;  %v2978_v31 = vld [vmem:[#allocation5 + $0x350] sm:$0xf0]  ;;  %v2853_v35 = vor.u32 %v3772_v27, %v2850_v29  ;;  %v3768_v40 = vld [vmem:[#allocation5 + $0x224] sm:$0xf]  ;;  %v2665_v27 = vor.u32 %v3727_v21, %v2664_v20  ;;  %v3791_v29 = vld [vmem:[#allocation5 + $0x2d4] sm:$0xf0] }
  0x69   :  { %1505 = vmatpush.bf16.msrb.mxu2 %v3317_v45  ;;  %v3106_v33 = vld [vmem:[#allocation5 + $0x450] sm:$0xf0]  ;;  %v2981_v36 = vor.u32 %v3804_v30, %v2978_v31  ;;  %v3800_v44 = vld [vmem:[#allocation5 + $0x324] sm:$0xf]  ;;  %v3048_v30 = vld [vmem:[#allocation5 + $0x3c8] sm:$0xf] }
  0x6a   :  { %1465 = vmatpush.bf16.msra.mxu0 %v2901_v62  ;;  %v3234_v39 = vld [vmem:[#allocation5 + $0x550] sm:$0xf0]  ;;  %v3109_v41 = vor.u32 %v3836_v32, %v3106_v33  ;;  %v3832_v46 = vld [vmem:[#allocation5 + $0x424] sm:$0xf]  ;;  %v3823_v32 = vld [vmem:[#allocation5 + $0x3d4] sm:$0xf0] }
  0x6b   :  { %1479 = vmatpush.bf16.msra.mxu1 %v3029_v63  ;;  %v2834_v43 = vld [vmem:[#allocation5 + $0x230] sm:$0xf0]  ;;  %v3237_v48 = vor.u32 %v3868_v38, %v3234_v39  ;;  %v3864_v49 = vld [vmem:[#allocation5 + $0x524] sm:$0xf]  ;;  %v2648_v33 = vld [vmem:[#allocation5 + $0xa8] sm:$0xf]  ;;  %v3049_v39 = vor.u32 %v3823_v32, %v3048_v30 }
  0x6c   :  { %1493 = vmatpush.bf16.msra.mxu3 %v3157_v3  ;;  %v2962_v45 = vld [vmem:[#allocation5 + $0x330] sm:$0xf0]  ;;  %v2837_v52 = vor.u32 %v3768_v40, %v2834_v43  ;;  %v3764_v56 = vld [vmem:[#allocation5 + $0x204] sm:$0xf]  ;;  %v3787_v43 = vld [vmem:[#allocation5 + $0x2b4] sm:$0xf0] }
  0x6d   :  { %1506 = vmatpush.bf16.msrb.mxu2 %v3301_v61  ;;  %v3090_v47 = vld [vmem:[#allocation5 + $0x430] sm:$0xf0]  ;;  %v2965_v53 = vor.u32 %v3800_v44, %v2962_v45  ;;  %v3796_v58 = vld [vmem:[#allocation5 + $0x304] sm:$0xf]  ;;  %v3032_v44 = vld [vmem:[#allocation5 + $0x3a8] sm:$0xf] }
  0x6e   :  { %1466 = vmatpush.bf16.msra.mxu0 %v2885_v11  ;;  %v3218_v51 = vld [vmem:[#allocation5 + $0x530] sm:$0xf0]  ;;  %v3093_v59 = vor.u32 %v3832_v46, %v3090_v47  ;;  %v3828_v62 = vld [vmem:[#allocation5 + $0x404] sm:$0xf]  ;;  %v3819_v46 = vld [vmem:[#allocation5 + $0x3b4] sm:$0xf0] }
  0x6f   :  { %1480 = vmatpush.bf16.msra.mxu1 %v3013_v12  ;;  %v2818_v57 = vld [vmem:[#allocation5 + $0x210] sm:$0xf0]  ;;  %v3221_v3 = vor.u32 %v3864_v49, %v3218_v51  ;;  %v3892_v5 = vld [vmem:[#allocation5 + $0x604] sm:$0xf]  ;;  %v2632_v47 = vld [vmem:[#allocation5 + $0x88] sm:$0xf] }
  0x70   :  { %1494 = vmatpush.bf16.msra.mxu3 %v3141_v16  ;;  %v2946_v61 = vld [vmem:[#allocation5 + $0x310] sm:$0xf0]  ;;  %v2821_v7 = vor.u32 %v3764_v56, %v2818_v57  ;;  %v3064_v16 = vld [vmem:[#allocation5 + $0x3e8] sm:$0xf]  ;;  %v3751_v51 = vld [vmem:[#allocation5 + $0x194] sm:$0xf0]  ;;  %v3033_v57 = vor.u32 %v3819_v46, %v3032_v44 }
  0x71   :  { %1507 = vmatpush.bf16.msrb.mxu2 %v3285_v10  ;;  %v3074_v63 = vld [vmem:[#allocation5 + $0x410] sm:$0xf0]  ;;  %v2949_v9 = vor.u32 %v3796_v58, %v2946_v61  ;;  %v3860_v10 = vld [vmem:[#allocation5 + $0x504] sm:$0xf]  ;;  %v3065_v26 = vor.u32 %v3827_v19, %v3064_v16  ;;  %v2760_v49 = vld [vmem:[#allocation5 + $0x188] sm:$0xf] }
  0x72   :  { %1467 = vmatpush.bf16.msra.mxu0 %v2869_v23  ;;  %v3330_v6 = vld [vmem:[#allocation5 + $0x610] sm:$0xf0]  ;;  %v3077_v12 = vor.u32 %v3828_v62, %v3074_v63  ;;  %v2792_v23 = vld [vmem:[#allocation5 + $0x1c8] sm:$0xf]  ;;  %v3783_v56 = vld [vmem:[#allocation5 + $0x294] sm:$0xf0]  ;;  %v2761_v62 = vor.u32 %v3751_v51, %v2760_v49 }
  0x73   :  { %1481 = vmatpush.bf16.msra.mxu1 %v2997_v24  ;;  %v3202_v11 = vld [vmem:[#allocation5 + $0x510] sm:$0xf0]  ;;  %v3333_v18 = vor.u32 %v3892_v5, %v3330_v6  ;;  %v3759_v24 = vld [vmem:[#allocation5 + $0x1d4] sm:$0xf0]  ;;  %v2616_v63 = vld [vmem:[#allocation5 + $0x68] sm:$0xf] }
  0x74   :  { %1495 = vmatpush.bf16.msra.mxu3 %v3125_v28  ;;  %v2920_v28 = vld [vmem:[#allocation5 + $0x2c8] sm:$0xf]  ;;  %v2793_v31 = vor.u32 %v3759_v24, %v2792_v23  ;;  %v3815_v61 = vld [vmem:[#allocation5 + $0x394] sm:$0xf0] }
  0x75   :  { %1508 = vmatpush.bf16.msrb.mxu2 %v3269_v22  ;;  %v3205_v22 = vor.u32 %v3860_v10, %v3202_v11  ;;  %v2921_v38 = vor.u32 %v3791_v29, %v2920_v28  ;;  %v3715_v0 = vld [vmem:[#allocation5 + $0x74] sm:$0xf0]  ;;  %v2744_v1 = vld [vmem:[#allocation5 + $0x168] sm:$0xf] }
  0x76   :  { %1468 = vmatpush.bf16.msra.mxu0 %v2853_v35  ;;  %v2776_v35 = vld [vmem:[#allocation5 + $0x1a8] sm:$0xf]  ;;  %v3747_v2 = vld [vmem:[#allocation5 + $0x174] sm:$0xf0]  ;;  %v2617_v5 = vor.u32 %v3715_v0, %v2616_v63 }
  0x77   :  { %1482 = vmatpush.bf16.msra.mxu1 %v2981_v36  ;;  %v3755_v36 = vld [vmem:[#allocation5 + $0x1b4] sm:$0xf0]  ;;  %v2872_v6 = vld [vmem:[#allocation5 + $0x268] sm:$0xf]  ;;  %v2745_v10 = vor.u32 %v3747_v2, %v2744_v1 }
  0x78   :  { %1496 = vmatpush.bf16.msra.mxu3 %v3109_v41  ;;  %v2904_v41 = vld [vmem:[#allocation5 + $0x2a8] sm:$0xf]  ;;  %v2777_v45 = vor.u32 %v3755_v36, %v2776_v35  ;;  %v3811_v11 = vld [vmem:[#allocation5 + $0x374] sm:$0xf0] }
  0x79   :  { %1509 = vmatpush.bf16.msrb.mxu2 %v3253_v34  ;;  %v3723_v34 = vld [vmem:[#allocation5 + $0xb4] sm:$0xf0]  ;;  %v2728_v14 = vld [vmem:[#allocation5 + $0x148] sm:$0xf] }
  0x7a   :  { %1469 = vmatpush.bf16.msra.mxu0 %v2837_v52  ;;  %v2649_v40 = vor.u32 %v3723_v34, %v2648_v33  ;;  %v2905_v52 = vor.u32 %v3787_v43, %v2904_v41  ;;  %v3743_v15 = vld [vmem:[#allocation5 + $0x154] sm:$0xf0]  ;;  %v2856_v19 = vld [vmem:[#allocation5 + $0x248] sm:$0xf] }
  0x7b   :  { %1483 = vmatpush.bf16.msra.mxu1 %v2965_v53  ;;  %v2888_v53 = vld [vmem:[#allocation5 + $0x288] sm:$0xf]  ;;  %v3775_v20 = vld [vmem:[#allocation5 + $0x254] sm:$0xf0] }
  0x7c   :  { %1497 = vmatpush.bf16.msra.mxu3 %v3093_v59  ;;  %v3016_v59 = vld [vmem:[#allocation5 + $0x388] sm:$0xf]  ;;  %v3807_v23 = vld [vmem:[#allocation5 + $0x354] sm:$0xf0]  ;;  %v2857_v28 = vor.u32 %v3775_v20, %v2856_v19 }
  0x7d   :  { %1510 = vmatpush.bf16.msrb.mxu2 %v3237_v48  ;;  %v3719_v48 = vld [vmem:[#allocation5 + $0x94] sm:$0xf0]  ;;  %v3017_v4 = vor.u32 %v3815_v61, %v3016_v59  ;;  %v2984_v21 = vld [vmem:[#allocation5 + $0x348] sm:$0xf]  ;;  %v2682_v59 = vld [vmem:[#allocation5 + $0xf8] sm:$0xf0] }
  0x7e   :  { %1470 = vmatpush.bf16.msra.mxu0 %v2821_v7  ;;  %v2633_v58 = vor.u32 %v3719_v48, %v2632_v47  ;;  %v3779_v7 = vld [vmem:[#allocation5 + $0x274] sm:$0xf0]  ;;  %v2584_v24 = vld [vmem:[#allocation5 + $0x28] sm:$0xf]  ;;  %v2985_v30 = vor.u32 %v3807_v23, %v2984_v21  ;;  %v2794_v23 = vld [vmem:[#allocation5 + $0x1d8] sm:$0xf0] }
  0x7f   :  { %1484 = vmatpush.bf16.msra.mxu1 %v2949_v9  ;;  %v3000_v9 = vld [vmem:[#allocation5 + $0x368] sm:$0xf]  ;;  %v2873_v16 = vor.u32 %v3779_v7, %v2872_v6  ;;  %v3771_v32 = vld [vmem:[#allocation5 + $0x234] sm:$0xf0] }
  0x80   :  { %1498 = vmatpush.bf16.msra.mxu3 %v3077_v12  ;;  %v2600_v12 = vld [vmem:[#allocation5 + $0x48] sm:$0xf]  ;;  %v3803_v34 = vld [vmem:[#allocation5 + $0x334] sm:$0xf0] }
  0x81   :  { %1511 = vmatpush.bf16.msrb.mxu2 %v3221_v3  ;;  %1471 = vmatmul.bf16.vlgmr.msra.gmra.mxu0 %v4281_v54  ;;  %v2889_v3 = vor.u32 %v3783_v56, %v2888_v53  ;;  %v2840_v29 = vld [vmem:[#allocation5 + $0x228] sm:$0xf]  ;;  %v3859_v43 = vld [vmem:[#allocation5 + $0x4f4] sm:$0xf0] }
  0x82   :  { %1526 = vmatpush.bf16.msrb.mxu0 %v3333_v18  ;;  %1485 = vmatmul.bf16.vlgmr.msra.gmra.mxu1 %v4285_v60  ;;  %v2968_v33 = vld [vmem:[#allocation5 + $0x328] sm:$0xf]  ;;  %v2841_v44 = vor.u32 %v3771_v32, %v2840_v29  ;;  %v3891_v46 = vld [vmem:[#allocation5 + $0x5f4] sm:$0xf0] }
  0x83   :  { %1533 = vmatpush.bf16.msrb.mxu1 %v2681_v13  ;;  %1499 = vmatmul.bf16.vlgmr.msra.gmra.mxu3 %v4297_v37  ;;  %v3711_v13 = vld [vmem:[#allocation5 + $0x54] sm:$0xf0]  ;;  %v2568_v36 = vld [vmem:[#allocation5 + $0x8] sm:$0xf]  ;;  %v2969_v47 = vor.u32 %v3803_v34, %v2968_v33  ;;  %v3753_v34 = vld [vmem:[#allocation5 + $0x1ac] sm:$0xf] }
  0x84   :  { %1547 = vmatpush.bf16.msrb.mxu3 %v2809_v17  ;;  %v3001_v17 = vor.u32 %v3811_v11, %v3000_v9  ;;  %v2601_v18 = vor.u32 %v3711_v13, %v2600_v12  ;;  %v3192_v41 = vld [vmem:[#allocation5 + $0x4e8] sm:$0xf]  ;;  %v3767_v51 = vld [vmem:[#allocation5 + $0x214] sm:$0xf0]  ;;  %v3761_v9 = vld [vmem:[#allocation5 + $0x1ec] sm:$0xf] }
  0x85   :  { %1512 = vmatpush.bf16.msrb.mxu2 %v3205_v22  ;;  %v2729_v22 = vor.u32 %v3743_v15, %v2728_v14  ;;  %v2824_v49 = vld [vmem:[#allocation5 + $0x208] sm:$0xf]  ;;  %v3193_v56 = vor.u32 %v3859_v43, %v3192_v41  ;;  %v3855_v63 = vld [vmem:[#allocation5 + $0x4d4] sm:$0xf0]  ;;  %v3725_v11 = vld [vmem:[#allocation5 + $0xcc] sm:$0xf] }
  0x86   :  { %1561 = vmatpush.bf16.msra.mxu0 %v2937_v25  ;;  %v3707_v25 = vld [vmem:[#allocation5 + $0x34] sm:$0xf0]  ;;  %v3304_v0 = vld [vmem:[#allocation5 + $0x5c8] sm:$0xf]  ;;  %v2825_v1 = vor.u32 %v3767_v51, %v2824_v49  ;;  %v2666_v14 = vld [vmem:[#allocation5 + $0xd8] sm:$0xf0] }
  0x87   :  { %1534 = vmatpush.bf16.msrb.mxu1 %v2665_v27  ;;  %v3739_v27 = vld [vmem:[#allocation5 + $0x134] sm:$0xf0]  ;;  %v3160_v15 = vld [vmem:[#allocation5 + $0x4a8] sm:$0xf]  ;;  %v2669_v20 = vor.u32 %v3725_v11, %v2666_v14  ;;  %v2762_v49 = vld [vmem:[#allocation5 + $0x198] sm:$0xf0] }
  0x88   :  { %1548 = vmatpush.bf16.msrb.mxu3 %v2793_v31  ;;  %1513 = vmatmul.bf16.vlgmr.msrb.gmra.mxu2 %v4299_v42  ;;  %v2585_v31 = vor.u32 %v3707_v25, %v2584_v24  ;;  %v3887_v2 = vld [vmem:[#allocation5 + $0x5d4] sm:$0xf0]  ;;  %v3721_v24 = vld [vmem:[#allocation5 + $0xac] sm:$0xf]  ;;  %v3272_v29 = vld [vmem:[#allocation5 + $0x588] sm:$0xf] }
  0x89   :  { %1575 = vmatpush.bf16.msra.mxu2 %v3065_v26  ;;  %v2712_v26 = vld [vmem:[#allocation5 + $0x128] sm:$0xf]  ;;  %v3305_v12 = vor.u32 %v3887_v2, %v3304_v0  ;;  %v3843_v41 = vld [vmem:[#allocation5 + $0x474] sm:$0xf0]  ;;  %v3713_v51 = vld [vmem:[#allocation5 + $0x6c] sm:$0xf] }
  0x8a   :  { %1562 = vmatpush.bf16.msra.mxu0 %v2921_v38  ;;  %v2713_v35 = vor.u32 %v3739_v27, %v2712_v26  ;;  %v3703_v38 = vld [vmem:[#allocation5 + $0x14] sm:$0xf0]  ;;  %v2650_v26 = vld [vmem:[#allocation5 + $0xb8] sm:$0xf0]  ;;  %v3144_v27 = vld [vmem:[#allocation5 + $0x488] sm:$0xf] }
  0x8b   :  { %1535 = vmatpush.bf16.msrb.mxu1 %v2649_v40  ;;  %v3735_v40 = vld [vmem:[#allocation5 + $0x114] sm:$0xf0]  ;;  %v2569_v48 = vor.u32 %v3703_v38, %v2568_v36  ;;  %v2653_v32 = vor.u32 %v3721_v24, %v2650_v26  ;;  %v3717_v36 = vld [vmem:[#allocation5 + $0x8c] sm:$0xf]  ;;  %v3256_v43 = vld [vmem:[#allocation5 + $0x568] sm:$0xf] }
  0x8c   :  { %1549 = vmatpush.bf16.msrb.mxu3 %v2777_v45  ;;  %v3320_v45 = vld [vmem:[#allocation5 + $0x5e8] sm:$0xf]  ;;  %v3745_v0 = vld [vmem:[#allocation5 + $0x16c] sm:$0xf]  ;;  %v2730_v14 = vld [vmem:[#allocation5 + $0x158] sm:$0xf0] }
  0x8d   :  { %1576 = vmatpush.bf16.msra.mxu2 %v3049_v39  ;;  %v2696_v39 = vld [vmem:[#allocation5 + $0x108] sm:$0xf]  ;;  %v3321_v61 = vor.u32 %v3891_v46, %v3320_v45  ;;  %v3709_v2 = vld [vmem:[#allocation5 + $0x4c] sm:$0xf]  ;;  %v3066_v26 = vld [vmem:[#allocation5 + $0x3f8] sm:$0xf0] }
  0x8e   :  { %1563 = vmatpush.bf16.msra.mxu0 %v2905_v52  ;;  %v2952_v52 = vld [vmem:[#allocation5 + $0x308] sm:$0xf]  ;;  %v2697_v53 = vor.u32 %v3735_v40, %v2696_v39  ;;  %v2634_v39 = vld [vmem:[#allocation5 + $0x98] sm:$0xf0]  ;;  %v3741_v11 = vld [vmem:[#allocation5 + $0x14c] sm:$0xf] }
  0x8f   :  { %1536 = vmatpush.bf16.msrb.mxu1 %v2633_v58  ;;  %v3729_v58 = vld [vmem:[#allocation5 + $0xec] sm:$0xf]  ;;  %v3128_v40 = vld [vmem:[#allocation5 + $0x468] sm:$0xf]  ;;  %v2637_v46 = vor.u32 %v3717_v36, %v2634_v39  ;;  %v2733_v24 = vor.u32 %v3741_v11, %v2730_v14 }
  0x90   :  { %1550 = vmatpush.bf16.msrb.mxu3 %v2761_v62  ;;  %v3176_v62 = vld [vmem:[#allocation5 + $0x4c8] sm:$0xf]  ;;  %v2685_v6 = vor.u32 %v3729_v58, %v2682_v59  ;;  %v3871_v59 = vld [vmem:[#allocation5 + $0x554] sm:$0xf0]  ;;  %v3789_v39 = vld [vmem:[#allocation5 + $0x2cc] sm:$0xf] }
  0x91   :  { %1577 = vmatpush.bf16.msra.mxu2 %v3033_v57  ;;  %3343 = vmatmul.msk.bf16.vlgmr.msrb.gmra.mxu0 %vm1333_vm0, %v4293_v50  ;;  %v3799_v57 = vld [vmem:[#allocation5 + $0x314] sm:$0xf0]  ;;  %v3177_v7 = vor.u32 %v3855_v63, %v3176_v62  ;;  %v3240_v58 = vld [vmem:[#allocation5 + $0x548] sm:$0xf]  ;;  %v3813_v11 = vld [vmem:[#allocation5 + $0x38c] sm:$0xf] }
  0x92   :  { %1564 = vmatpush.bf16.msra.mxu0 %v2889_v3  ;;  %v3336_v3 = vld [vmem:[#allocation5 + $0x608] sm:$0xf] }
  0x93   :  { %1537 = vmatpush.bf16.msrb.mxu1 %v2617_v5  ;;  %v2953_v5 = vor.u32 %v3799_v57, %v2952_v52  ;;  %v3839_v57 = vld [vmem:[#allocation5 + $0x454] sm:$0xf0] }
  0x94   :  { %1551 = vmatpush.bf16.msrb.mxu3 %v2745_v10  ;;  %v2810_v10 = vld [vmem:[#allocation5 + $0x1f8] sm:$0xf0] }
  0x95   :  { %1578 = vmatpush.bf16.msra.mxu2 %v3017_v4  ;;  %v3895_v4 = vld [vmem:[#allocation5 + $0x614] sm:$0xf0]  ;;  %v2813_v19 = vor.u32 %v3761_v9, %v2810_v10 }
  0x96   :  { %1565 = vmatpush.bf16.msra.mxu0 %v2873_v16  ;;  %v3337_v13 = vor.u32 %v3895_v4, %v3336_v3  ;;  %v3851_v16 = vld [vmem:[#allocation5 + $0x4b4] sm:$0xf0]  ;;  %v3241_v3 = vor.u32 %v3871_v59, %v3240_v58  ;;  %v2602_v4 = vld [vmem:[#allocation5 + $0x58] sm:$0xf0]  ;;  %v3785_v58 = vld [vmem:[#allocation5 + $0x2ac] sm:$0xf] }
  0x97   :  { %1538 = vmatpush.bf16.msrb.mxu1 %v2601_v18  ;;  %v3883_v18 = vld [vmem:[#allocation5 + $0x5b4] sm:$0xf0]  ;;  %v3161_v21 = vor.u32 %v3851_v16, %v3160_v15  ;;  %v3705_v15 = vld [vmem:[#allocation5 + $0x2c] sm:$0xf]  ;;  %v2586_v16 = vld [vmem:[#allocation5 + $0x38] sm:$0xf0] }
  0x98   :  { %1552 = vmatpush.bf16.msrb.mxu3 %v2729_v22  ;;  %v3757_v22 = vld [vmem:[#allocation5 + $0x1cc] sm:$0xf]  ;;  %v3867_v9 = vld [vmem:[#allocation5 + $0x534] sm:$0xf0]  ;;  %v2906_v59 = vld [vmem:[#allocation5 + $0x2b8] sm:$0xf0] }
  0x99   :  { %1579 = vmatpush.bf16.msra.mxu2 %v3001_v17  ;;  %v3288_v17 = vld [vmem:[#allocation5 + $0x5a8] sm:$0xf] }
  0x9a   :  { %1566 = vmatpush.bf16.msra.mxu0 %v2857_v28  ;;  %v3289_v25 = vor.u32 %v3883_v18, %v3288_v17  ;;  %v3847_v28 = vld [vmem:[#allocation5 + $0x494] sm:$0xf0]  ;;  %v3080_v18 = vld [vmem:[#allocation5 + $0x408] sm:$0xf] }
  0x9b   :  { %1539 = vmatpush.bf16.msrb.mxu1 %v2585_v31  ;;  %v2797_v31 = vor.u32 %v3757_v22, %v2794_v23  ;;  %v3145_v33 = vor.u32 %v3847_v28, %v3144_v27  ;;  %v3793_v22 = vld [vmem:[#allocation5 + $0x2ec] sm:$0xf]  ;;  %v2938_v23 = vld [vmem:[#allocation5 + $0x2f8] sm:$0xf0]  ;;  %v2589_v27 = vor.u32 %v3705_v15, %v2586_v16 }
  0x9c   :  { %1553 = vmatpush.bf16.msrb.mxu3 %v2713_v35  ;;  %v2778_v35 = vld [vmem:[#allocation5 + $0x1b8] sm:$0xf0]  ;;  %v3881_v16 = vld [vmem:[#allocation5 + $0x5ac] sm:$0xf] }
  0x9d   :  { %1580 = vmatpush.bf16.msra.mxu2 %v2985_v30  ;;  %v3879_v30 = vld [vmem:[#allocation5 + $0x594] sm:$0xf0]  ;;  %v2781_v45 = vor.u32 %v3753_v34, %v2778_v35  ;;  %v2570_v34 = vld [vmem:[#allocation5 + $0x18] sm:$0xf0]  ;;  %v3857_v35 = vld [vmem:[#allocation5 + $0x4ec] sm:$0xf] }
  0x9e   :  { %1567 = vmatpush.bf16.msra.mxu0 %v2841_v44  ;;  %v3273_v38 = vor.u32 %v3879_v30, %v3272_v29  ;;  %v3875_v44 = vld [vmem:[#allocation5 + $0x574] sm:$0xf0]  ;;  %v3737_v29 = vld [vmem:[#allocation5 + $0x12c] sm:$0xf]  ;;  %v2714_v30 = vld [vmem:[#allocation5 + $0x138] sm:$0xf0] }
  0x9f   :  { %1540 = vmatpush.bf16.msrb.mxu1 %v2569_v48  ;;  %v3749_v48 = vld [vmem:[#allocation5 + $0x18c] sm:$0xf]  ;;  %v3257_v52 = vor.u32 %v3875_v44, %v3256_v43  ;;  %v3050_v44 = vld [vmem:[#allocation5 + $0x3d8] sm:$0xf0] }
  0xa0   :  { %1554 = vmatpush.bf16.msrb.mxu3 %v2697_v53  ;;  %v2618_v53 = vld [vmem:[#allocation5 + $0x78] sm:$0xf0]  ;;  %v3821_v43 = vld [vmem:[#allocation5 + $0x3cc] sm:$0xf] }
  0xa1   :  { %1581 = vmatpush.bf16.msra.mxu2 %v2969_v47  ;;  %v3129_v47 = vor.u32 %v3843_v41, %v3128_v40  ;;  %v2621_v62 = vor.u32 %v3713_v51, %v2618_v53  ;;  %v2922_v40 = vld [vmem:[#allocation5 + $0x2d8] sm:$0xf0]  ;;  %v2717_v41 = vor.u32 %v3737_v29, %v2714_v30  ;;  %v3889_v51 = vld [vmem:[#allocation5 + $0x5ec] sm:$0xf] }
  0xa2   :  { %1568 = vmatpush.bf16.msra.mxu0 %v2825_v1  ;;  %1541 = vmatmul.bf16.vlgmr.msrb.gmra.mxu1 %v4283_v55  ;;  %v2746_v1 = vld [vmem:[#allocation5 + $0x178] sm:$0xf0]  ;;  %v3853_v53 = vld [vmem:[#allocation5 + $0x4cc] sm:$0xf] }
  0xa3   :  { %1589 = vmatpush.bf16.msra.mxu1 %v3193_v56  ;;  %1555 = vmatmul.bf16.vlgmr.msrb.gmra.mxu3 %v4289_v8  ;;  %v3112_v56 = vld [vmem:[#allocation5 + $0x448] sm:$0xf]  ;;  %v2749_v10 = vor.u32 %v3745_v0, %v2746_v1  ;;  %v3841_v29 = vld [vmem:[#allocation5 + $0x46c] sm:$0xf] }
  0xa4   :  { %1603 = vmatpush.bf16.msra.mxu3 %v3321_v61  ;;  %v2765_v61 = vor.u32 %v3749_v48, %v2762_v49  ;;  %v3113_v63 = vor.u32 %v3839_v57, %v3112_v56  ;;  %v2925_v49 = vor.u32 %v3789_v39, %v2922_v40  ;;  %v3053_v56 = vor.u32 %v3821_v43, %v3050_v44  ;;  %v3178_v57 = vld [vmem:[#allocation5 + $0x4d8] sm:$0xf0]  ;;  %v3873_v39 = vld [vmem:[#allocation5 + $0x56c] sm:$0xf] }
  0xa5   :  { %1582 = vmatpush.bf16.msra.mxu2 %v2953_v5  ;;  %1569 = vmatmul.bf16.vlgmr.msra.gmra.mxu0 %v4281_v54  ;;  %v3096_v5 = vld [vmem:[#allocation5 + $0x428] sm:$0xf]  ;;  %v3181_v1 = vor.u32 %v3853_v53, %v3178_v57  ;;  %v3258_v40 = vld [vmem:[#allocation5 + $0x578] sm:$0xf0] }
  0xa6   :  { %1624 = vmatpush.bf16.msrb.mxu0 %v3337_v13  ;;  %v3114_v44 = vld [vmem:[#allocation5 + $0x458] sm:$0xf0] }
  0xa7   :  { %1590 = vmatpush.bf16.msra.mxu1 %v3177_v7  ;;  %v3224_v7 = vld [vmem:[#allocation5 + $0x528] sm:$0xf]  ;;  %v3242_v57 = vld [vmem:[#allocation5 + $0x558] sm:$0xf0] }
  0xa8   :  { %1604 = vmatpush.bf16.msra.mxu3 %v3305_v12  ;;  %1583 = vmatmul.bf16.vlgmr.msra.gmra.mxu2 %v4285_v60  ;;  %v2605_v12 = vor.u32 %v3709_v2, %v2602_v4  ;;  %v3225_v17 = vor.u32 %v3867_v9, %v3224_v7  ;;  %v2909_v2 = vor.u32 %v3785_v58, %v2906_v59  ;;  %v3306_v4 = vld [vmem:[#allocation5 + $0x5d8] sm:$0xf0]  ;;  %v3781_v9 = vld [vmem:[#allocation5 + $0x28c] sm:$0xf] }
  0xa9   :  { %1631 = vmatpush.bf16.msrb.mxu2 %v2685_v6  ;;  %v3835_v6 = vld [vmem:[#allocation5 + $0x434] sm:$0xf0]  ;;  %v3162_v7 = vld [vmem:[#allocation5 + $0x4b8] sm:$0xf0]  ;;  %v3833_v58 = vld [vmem:[#allocation5 + $0x42c] sm:$0xf] }
  0xaa   :  { %1645 = vmatpush.bf16.msra.mxu0 %v2813_v19  ;;  %v3097_v13 = vor.u32 %v3835_v6, %v3096_v5  ;;  %v3831_v19 = vld [vmem:[#allocation5 + $0x414] sm:$0xf0]  ;;  %v3849_v5 = vld [vmem:[#allocation5 + $0x4ac] sm:$0xf]  ;;  %v3098_v59 = vld [vmem:[#allocation5 + $0x438] sm:$0xf0] }
  0xab   :  { %1591 = vmatpush.bf16.msra.mxu1 %v3161_v21  ;;  %v3863_v21 = vld [vmem:[#allocation5 + $0x514] sm:$0xf0]  ;;  %v3081_v28 = vor.u32 %v3831_v19, %v3080_v18  ;;  %v3165_v14 = vor.u32 %v3849_v5, %v3162_v7  ;;  %v3845_v18 = vld [vmem:[#allocation5 + $0x48c] sm:$0xf]  ;;  %v3338_v5 = vld [vmem:[#allocation5 + $0x618] sm:$0xf0] }
  0xac   :  { %1605 = vmatpush.bf16.msra.mxu3 %v3289_v25  ;;  %v3825_v25 = vld [vmem:[#allocation5 + $0x3ec] sm:$0xf] }
  0xad   :  { %1632 = vmatpush.bf16.msrb.mxu2 %v2669_v20  ;;  %v3208_v20 = vld [vmem:[#allocation5 + $0x508] sm:$0xf]  ;;  %v3069_v36 = vor.u32 %v3825_v25, %v3066_v26 }
  0xae   :  { %1646 = vmatpush.bf16.msra.mxu0 %v2797_v31  ;;  %v3209_v31 = vor.u32 %v3863_v21, %v3208_v20  ;;  %v3146_v20 = vld [vmem:[#allocation5 + $0x498] sm:$0xf0]  ;;  %v3777_v21 = vld [vmem:[#allocation5 + $0x26c] sm:$0xf] }
  0xaf   :  { %1592 = vmatpush.bf16.msra.mxu1 %v3145_v33  ;;  %v3701_v33 = vld [vmem:[#allocation5 + $0xc] sm:$0xf]  ;;  %v3149_v25 = vor.u32 %v3845_v18, %v3146_v20  ;;  %v3082_v18 = vld [vmem:[#allocation5 + $0x418] sm:$0xf0] }
  0xb0   :  { %1606 = vmatpush.bf16.msra.mxu3 %v3273_v38  ;;  %v3194_v38 = vld [vmem:[#allocation5 + $0x4f8] sm:$0xf0] }
  0xb1   :  { %1633 = vmatpush.bf16.msrb.mxu2 %v2653_v32  ;;  %v2941_v32 = vor.u32 %v3793_v22, %v2938_v23  ;;  %v3197_v48 = vor.u32 %v3857_v35, %v3194_v38  ;;  %v2874_v22 = vld [vmem:[#allocation5 + $0x278] sm:$0xf0]  ;;  %v3809_v23 = vld [vmem:[#allocation5 + $0x36c] sm:$0xf] }
  0xb2   :  { %1647 = vmatpush.bf16.msra.mxu0 %v2781_v45  ;;  %v2573_v45 = vor.u32 %v3701_v33, %v2570_v34  ;;  %v2877_v26 = vor.u32 %v3777_v21, %v2874_v22  ;;  %v2858_v33 = vld [vmem:[#allocation5 + $0x258] sm:$0xf0]  ;;  %v3805_v34 = vld [vmem:[#allocation5 + $0x34c] sm:$0xf]  ;;  %v3468_v21 = vld [vmem:[#allocation8 + $0xf0] sm:$0xf] }
  0xb3   :  { %1593 = vmatpush.bf16.msra.mxu1 %v3129_v47  ;;  %v2698_v47 = vld [vmem:[#allocation5 + $0x118] sm:$0xf0] }
  0xb4   :  { %1607 = vmatpush.bf16.msra.mxu3 %v3257_v52  ;;  %v3322_v52 = vld [vmem:[#allocation5 + $0x5f8] sm:$0xf0] }
  0xb5   :  { %1634 = vmatpush.bf16.msrb.mxu2 %v2637_v46  ;;  %3344 = vmatmul.msk.bf16.vlgmr.msrb.gmra.mxu0 %vm1333_vm0, %v4293_v50  ;;  %v3733_v46 = vld [vmem:[#allocation5 + $0x10c] sm:$0xf]  ;;  %v3325_v0 = vor.u32 %v3889_v51, %v3322_v52  ;;  %v2986_v35 = vld [vmem:[#allocation5 + $0x358] sm:$0xf0]  ;;  %v4321_v52 = vld [vmem:[#allocation7] sm:$0xf] }
  0xb6   :  { %1648 = vmatpush.bf16.msra.mxu0 %v2765_v61  ;;  %v2701_v61 = vor.u32 %v3733_v46, %v2698_v47  ;;  %v2989_v43 = vor.u32 %v3805_v34, %v2986_v35  ;;  %v2842_v46 = vld [vmem:[#allocation5 + $0x238] sm:$0xf0]  ;;  %v3801_v47 = vld [vmem:[#allocation5 + $0x32c] sm:$0xf]  ;;  %v3388_v35 = vld [vmem:[#allocation8 + $0x50] sm:$0xf] }
  0xb7   :  { %1594 = vmatpush.bf16.msra.mxu1 %v3113_v63  ;;  %v3034_v63 = vld [vmem:[#allocation5 + $0x3b8] sm:$0xf0]  ;;  %v3869_v51 = vld [vmem:[#allocation5 + $0x54c] sm:$0xf] }
  0xb8   :  { %1608 = vmatpush.bf16.msra.mxu3 %v3241_v3  ;;  %v3885_v3 = vld [vmem:[#allocation5 + $0x5cc] sm:$0xf]  ;;  %v3245_v7 = vor.u32 %v3869_v51, %v3242_v57  ;;  %v3927_v22 = vld [vmem:[#allocation8 + $0xf4] sm:$0xf0] }
  0xb9   :  { %1635 = vmatpush.bf16.msrb.mxu2 %v2621_v62  ;;  %v3817_v62 = vld [vmem:[#allocation5 + $0x3ac] sm:$0xf] }
  0xba   :  { %1649 = vmatpush.bf16.msra.mxu0 %v2749_v10  ;;  %v3037_v6 = vor.u32 %v3817_v62, %v3034_v63  ;;  %v2890_v10 = vld [vmem:[#allocation5 + $0x298] sm:$0xf0]  ;;  %v3765_v63 = vld [vmem:[#allocation5 + $0x20c] sm:$0xf] }
  0xbb   :  { %1595 = vmatpush.bf16.msra.mxu1 %v3097_v13  ;;  %v3309_v13 = vor.u32 %v3885_v3, %v3306_v4  ;;  %v2893_v15 = vor.u32 %v3781_v9, %v2890_v10  ;;  %v2954_v3 = vld [vmem:[#allocation5 + $0x318] sm:$0xf0]  ;;  %v3893_v4 = vld [vmem:[#allocation5 + $0x60c] sm:$0xf]  ;;  %v3404_v9 = vld [vmem:[#allocation8 + $0x70] sm:$0xf] }
  0xbc   :  { %1609 = vmatpush.bf16.msra.mxu3 %v3225_v17  ;;  %v3290_v17 = vld [vmem:[#allocation5 + $0x5b8] sm:$0xf0] }
  0xbd   :  { %1636 = vmatpush.bf16.msrb.mxu2 %v2605_v12  ;;  %v3018_v12 = vld [vmem:[#allocation5 + $0x398] sm:$0xf0] }
  0xbe   :  { %1650 = vmatpush.bf16.msra.mxu0 %v2733_v24  ;;  %v3021_v19 = vor.u32 %v3813_v11, %v3018_v12  ;;  %v3002_v24 = vld [vmem:[#allocation5 + $0x378] sm:$0xf0]  ;;  %v3101_v11 = vor.u32 %v3833_v58, %v3098_v59  ;;  %v3372_v58 = vld [vmem:[#allocation8 + $0x30] sm:$0xf] }
  0xbf   :  { %1596 = vmatpush.bf16.msra.mxu1 %v3081_v28  ;;  %v3274_v28 = vld [vmem:[#allocation5 + $0x598] sm:$0xf0]  ;;  %v3005_v30 = vor.u32 %v3809_v23, %v3002_v24  ;;  %v3396_v24 = vld [vmem:[#allocation8 + $0x60] sm:$0xf] }
  0xc0   :  { %1610 = vmatpush.bf16.msra.mxu3 %v3209_v31  ;;  %v3130_v31 = vld [vmem:[#allocation5 + $0x478] sm:$0xf0] }
  0xc1   :  { %1637 = vmatpush.bf16.msrb.mxu2 %v2589_v27  ;;  %v3877_v27 = vld [vmem:[#allocation5 + $0x58c] sm:$0xf]  ;;  %v3911_v10 = vld [vmem:[#allocation8 + $0x74] sm:$0xf0] }
  0xc2   :  { %1651 = vmatpush.bf16.msra.mxu0 %v2717_v41  ;;  %1597 = vmatmul.bf16.vlgmr.msra.gmra.mxu1 %v4297_v37  ;;  %v3837_v41 = vld [vmem:[#allocation5 + $0x44c] sm:$0xf]  ;;  %v3405_v20 = vor.u32 %v3911_v10, %v3404_v9  ;;  %v3903_v59 = vld [vmem:[#allocation8 + $0x34] sm:$0xf0] }
  0xc3   :  { %1659 = vmatpush.bf16.msrb.mxu1 %v2941_v32  ;;  %1611 = vmatmul.bf16.vlgmr.msra.gmra.mxu3 %v4299_v42  ;;  %v3773_v32 = vld [vmem:[#allocation5 + $0x24c] sm:$0xf]  ;;  %v3117_v53 = vor.u32 %v3837_v41, %v3114_v44 }
  0xc4   :  { %1673 = vmatpush.bf16.msrb.mxu3 %v3069_v36  ;;  %v3133_v36 = vor.u32 %v3841_v29, %v3130_v31  ;;  %v2861_v38 = vor.u32 %v3773_v32, %v2858_v33  ;;  %v3469_v29 = vor.u32 %v3927_v22, %v3468_v21  ;;  %v3460_v31 = vld [vmem:[#allocation8 + $0xe0] sm:$0xf]  ;;  %v3925_v32 = vld [vmem:[#allocation8 + $0xe4] sm:$0xf0]  ;;  %v3420_v22 = vld [vmem:[#allocation8 + $0x90] sm:$0xf] }
  0xc5   :  { %1638 = vmatpush.bf16.msrb.mxu2 %v2573_v45  ;;  %v3769_v45 = vld [vmem:[#allocation5 + $0x22c] sm:$0xf]  ;;  %v3461_v41 = vor.u32 %v3925_v32, %v3460_v31  ;;  %v3412_v32 = vld [vmem:[#allocation8 + $0x80] sm:$0xf] }
  0xc6   :  { %1652 = vmatpush.bf16.msra.mxu0 %v2701_v61  ;;  %v1346_v61 = vpop.f32.mrf.mxu0 }
  0xc7   :  { %1660 = vmatpush.bf16.msrb.mxu1 %v2925_v49  ;;  %v3261_v49 = vor.u32 %v3873_v39, %v3258_v40 }
  0xc8   :  { %1674 = vmatpush.bf16.msrb.mxu3 %v3053_v56  ;;  %1639 = vmatmul.bf16.vlgmr.msrb.gmra.mxu2 %v4283_v55  ;;  %v3293_v55 = vor.u32 %v3881_v16, %v3290_v17  ;;  %v2845_v56 = vor.u32 %v3769_v45, %v2842_v46  ;;  %v3829_v17 = vld [vmem:[#allocation5 + $0x40c] sm:$0xf]  ;;  %v1388_v39 = vpop.f32.mrf.mxu3  ;;  %v3452_v45 = vld [vmem:[#allocation8 + $0xd0] sm:$0xf]  ;;  %v3923_v46 = vld [vmem:[#allocation8 + $0xd4] sm:$0xf0] }
  0xc9   :  { %1687 = vmatpush.bf16.msra.mxu2 %v3197_v48  ;;  %1653 = vmatmul.bf16.vlgmr.msra.gmra.mxu0 %v4289_v8  ;;  %v3277_v8 = vor.u32 %v3877_v27, %v3274_v28  ;;  %v2970_v48 = vld [vmem:[#allocation5 + $0x338] sm:$0xf0] }
  0xca   :  { %1701 = vmatpush.bf16.msrb.mxu0 %v3325_v0  ;;  %v2973_v62 = vor.u32 %v3801_v47, %v2970_v48  ;;  %v2826_v0 = vld [vmem:[#allocation5 + $0x218] sm:$0xf0]  ;;  %v3905_v47 = vld [vmem:[#allocation8 + $0x44] sm:$0xf0] }
  0xcb   :  { %1661 = vmatpush.bf16.msrb.mxu1 %v2909_v2  ;;  %v1360_v2 = vpop.f32.mrf.mxu1  ;;  %v2829_v12 = vor.u32 %v3765_v63, %v2826_v0  ;;  %v3210_v27 = vld [vmem:[#allocation5 + $0x518] sm:$0xf0] }
  0xcc   :  { %1675 = vmatpush.bf16.msrb.mxu3 %v3037_v6  ;;  %v1374_v6 = vpop.f32.mrf.mxu2 }
  0xcd   :  { %1688 = vmatpush.bf16.msra.mxu2 %v3181_v1  ;;  %v3797_v1 = vld [vmem:[#allocation5 + $0x30c] sm:$0xf] }
  0xce   :  { %1702 = vmatpush.bf16.msrb.mxu0 %v3309_v13  ;;  %v3865_v13 = vld [vmem:[#allocation5 + $0x52c] sm:$0xf]  ;;  %v2957_v16 = vor.u32 %v3797_v1, %v2954_v3  ;;  %v1348_v33 = vpop.f32.mrf.mxu0  ;;  %v3373_v1 = vor.u32 %v3903_v59, %v3372_v58  ;;  %v3919_v3 = vld [vmem:[#allocation8 + $0xb4] sm:$0xf0]  ;;  %v3904_v58 = vld [vmem:[#allocation8 + $0x44] sm:$0xf] }
  0xcf   :  { %1662 = vmatpush.bf16.msrb.mxu1 %v2893_v15  ;;  %v345_v15 = vperm.slane %v4321_v52, 0  ;;  %v3382_v59 = vld [vmem:[#allocation8 + $0x48] sm:$0xf0] }
  0xd0   :  { %1676 = vmatpush.bf16.msrb.mxu3 %v3021_v19  ;;  %v3341_v19 = vor.u32 %v3893_v4, %v3338_v5  ;;  %v1390_v4 = vpop.f32.mrf.mxu3 }
  0xd1   :  { %1689 = vmatpush.bf16.msra.mxu2 %v3165_v14  ;;  %v3226_v14 = vld [vmem:[#allocation5 + $0x538] sm:$0xf0]  ;;  %v1347_v28 = vadd.f32 %v1346_v61, %v345_v15 }
  0xd2   :  { %1703 = vmatpush.bf16.msrb.mxu0 %v3293_v55  ;;  %v3229_v23 = vor.u32 %v3865_v13, %v3226_v14  ;;  %v3909_v55 = vld [vmem:[#allocation8 + $0x64] sm:$0xf0] }
  0xd3   :  { %1663 = vmatpush.bf16.msrb.mxu1 %v2877_v26  ;;  %v3861_v26 = vld [vmem:[#allocation5 + $0x50c] sm:$0xf] }
  0xd4   :  { %1677 = vmatpush.bf16.msrb.mxu3 %v3005_v30  ;;  %v3397_v30 = vor.u32 %v3909_v55, %v3396_v24  ;;  %v3213_v34 = vor.u32 %v3861_v26, %v3210_v27  ;;  %v1376_v40 = vpop.f32.mrf.mxu2  ;;  %v3897_v26 = vld [vmem:[#allocation8 + $0x4] sm:$0xf0] }
  0xd5   :  { %1690 = vmatpush.bf16.msra.mxu2 %v3149_v25  ;;  %v3085_v25 = vor.u32 %v3829_v17, %v3082_v18 }
  0xd6   :  { %1704 = vmatpush.bf16.msrb.mxu0 %v3277_v8  ;;  %v3907_v8 = vld [vmem:[#allocation8 + $0x54] sm:$0xf0] }
  0xd7   :  { %1664 = vmatpush.bf16.msrb.mxu1 %v2861_v38  ;;  %v1361_v38 = vadd.f32 %v1360_v2, %v1347_v28  ;;  %v3389_v44 = vor.u32 %v3907_v8, %v3388_v35  ;;  %v3436_v2 = vld [vmem:[#allocation8 + $0xb0] sm:$0xf]  ;;  %v3910_v28 = vld [vmem:[#allocation8 + $0x74] sm:$0xf] }
  0xd8   :  { %1678 = vmatpush.bf16.msrb.mxu3 %v2989_v43  ;;  %v1349_v43 = vadd.f32 %v1348_v33, %v345_v15  ;;  %v3356_v15 = vld [vmem:[#allocation8 + $0x10] sm:$0xf]  ;;  %v3913_v33 = vld [vmem:[#allocation8 + $0x84] sm:$0xf0]  ;;  %v3926_v8 = vld [vmem:[#allocation8 + $0xf4] sm:$0xf] }
  0xd9   :  { %1691 = vmatpush.bf16.msra.mxu2 %v3133_v36  ;;  %v1362_v36 = vpop.f32.mrf.mxu1  ;;  %v1375_v48 = vadd.f32 %v1374_v6, %v1361_v38  ;;  %v3901_v6 = vld [vmem:[#allocation8 + $0x24] sm:$0xf0] }
  0xda   :  { %1705 = vmatpush.bf16.msrb.mxu0 %v3261_v49  ;;  %v3453_v49 = vor.u32 %v3923_v46, %v3452_v45 }
  0xdb   :  { %1665 = vmatpush.bf16.msrb.mxu1 %v2845_v56  ;;  %v3921_v56 = vld [vmem:[#allocation8 + $0xc4] sm:$0xf0] }
  0xdc   :  { %1679 = vmatpush.bf16.msrb.mxu3 %v2973_v62  ;;  %v1389_v62 = vadd.f32 %v1388_v39, %v1375_v48  ;;  %v1430_v63 = vpop.f32.mrf.mxu2  ;;  %v3908_v39 = vld [vmem:[#allocation8 + $0x64] sm:$0xf]  ;;  %v3906_v48 = vld [vmem:[#allocation8 + $0x54] sm:$0xf] }
  0xdd   :  { %1692 = vmatpush.bf16.msra.mxu2 %v3117_v53  ;;  %v3444_v53 = vld [vmem:[#allocation8 + $0xc0] sm:$0xf] }
  0xde   :  { %1706 = vmatpush.bf16.msrb.mxu0 %v3245_v7  ;;  %v1402_v57 = vpop.f32.mrf.mxu0  ;;  %v3437_v7 = vor.u32 %v3919_v3, %v3436_v2  ;;  %v3902_v2 = vld [vmem:[#allocation8 + $0x34] sm:$0xf]  ;;  %v3374_v3 = vld [vmem:[#allocation8 + $0x38] sm:$0xf0] }
  0xdf   :  { %1666 = vmatpush.bf16.msrb.mxu1 %v2829_v12  ;;  %v1403_v5 = vadd.f32 %v1402_v57, %v1389_v62  ;;  %v3917_v12 = vld [vmem:[#allocation8 + $0xa4] sm:$0xf0]  ;;  %v346_v57 = vperm.slane %v4321_v52, 1 }
  0xe0   :  { %1680 = vmatpush.bf16.msrb.mxu3 %v2957_v16  ;;  %v3899_v16 = vld [vmem:[#allocation8 + $0x14] sm:$0xf0] }
  0xe1   :  { %1693 = vmatpush.bf16.msra.mxu2 %v3101_v11  ;;  %v1416_v61 = vpop.f32.mrf.mxu1  ;;  %v3428_v11 = vld [vmem:[#allocation8 + $0xa0] sm:$0xf]  ;;  %v3357_v21 = vor.u32 %v3899_v16, %v3356_v15  ;;  %v3532_v15 = vld [vmem:[#allocation8 + $0x170] sm:$0xf]  ;;  %v3943_v16 = vld [vmem:[#allocation8 + $0x174] sm:$0xf0] }
  0xe2   :  { %1707 = vmatpush.bf16.msrb.mxu0 %v3229_v23  ;;  %1667 = vmatmul.bf16.vlgmr.msrb.gmra.mxu1 %v4281_v54  ;;  %v3380_v54 = vld [vmem:[#allocation8 + $0x40] sm:$0xf]  ;;  %v1417_v13 = vadd.f32 %v1416_v61, %v1403_v5  ;;  %v3915_v23 = vld [vmem:[#allocation8 + $0x94] sm:$0xf0] }
  0xe3   :  { %1722 = vmatpush.bf16.msra.mxu1 %v3341_v19  ;;  %1681 = vmatmul.bf16.vlgmr.msrb.gmra.mxu3 %v4285_v60  ;;  %v1363_v60 = vadd.f32 %v1362_v36, %v1349_v43  ;;  %v3381_v51 = vor.u32 %v3905_v47, %v3380_v54  ;;  %v3429_v19 = vor.u32 %v3917_v12, %v3428_v11  ;;  %v3470_v36 = vld [vmem:[#allocation8 + $0xf8] sm:$0xf0]  ;;  %v3924_v54 = vld [vmem:[#allocation8 + $0xe4] sm:$0xf]  ;;  %v3462_v47 = vld [vmem:[#allocation8 + $0xe8] sm:$0xf0] }
  0xe4   :  { %2131 = vmatpush.bf16.msra.mxu3 %v3405_v20  ;;  %v1431_v24 = vadd.f32 %v1430_v63, %v1417_v13  ;;  %v1432_v55 = vpop.f32.mrf.mxu2  ;;  %v3413_v43 = vor.u32 %v3913_v33, %v3412_v32  ;;  %v3385_v63 = vor.u32 %v3904_v58, %v3382_v59  ;;  %v3896_v32 = vld [vmem:[#allocation8 + $0x4] sm:$0xf]  ;;  %v3914_v33 = vld [vmem:[#allocation8 + $0x94] sm:$0xf]  ;;  %v3500_v58 = vld [vmem:[#allocation8 + $0x130] sm:$0xf] }
  0xe5   :  { %1694 = vmatpush.bf16.msra.mxu2 %v3085_v25  ;;  %v1377_v0 = vadd.f32 %v1376_v40, %v1363_v60  ;;  %v3348_v25 = vld [vmem:[#allocation8] sm:$0xf]  ;;  %v3398_v40 = vld [vmem:[#allocation8 + $0x68] sm:$0xf0]  ;;  %v3465_v60 = vor.u32 %v3924_v54, %v3462_v47  ;;  %v3935_v59 = vld [vmem:[#allocation8 + $0x134] sm:$0xf0] }
  0xe6   :  { %1708 = vmatpush.bf16.msrb.mxu0 %v3213_v34  ;;  %v1404_v14 = vpop.f32.mrf.mxu0  ;;  %v3349_v31 = vor.u32 %v3897_v26, %v3348_v25  ;;  %v1729_v34 = vmax.f32 %v1431_v24, 0.0  ;;  %v1444_v38 = vpop.f32.mrf.mxu3  ;;  %v3401_v46 = vor.u32 %v3908_v39, %v3398_v40  ;;  %v3358_v25 = vld [vmem:[#allocation8 + $0x18] sm:$0xf0]  ;;  %v3524_v26 = vld [vmem:[#allocation8 + $0x160] sm:$0xf] }
  0xe7   :  { %2145 = vmatpush.bf16.msrb.mxu1 %v3469_v29  ;;  %v1391_v9 = vadd.f32 %v1390_v4, %v1377_v0  ;;  %v3406_v29 = vld [vmem:[#allocation8 + $0x78] sm:$0xf0]  ;;  %v3446_v0 = vld [vmem:[#allocation8 + $0xc8] sm:$0xf0]  ;;  %v3939_v39 = vld [vmem:[#allocation8 + $0x154] sm:$0xf0] }
  0xe8   :  { %2132 = vmatpush.bf16.msra.mxu3 %v3397_v30  ;;  %1695 = vmatmul.bf16.vlgmr.msra.gmra.mxu2 %v4297_v37  ;;  %v3445_v37 = vor.u32 %v3921_v56, %v3444_v53  ;;  %v3409_v35 = vor.u32 %v3910_v28, %v3406_v29  ;;  %v3922_v53 = vld [vmem:[#allocation8 + $0xd4] sm:$0xf]  ;;  %v3454_v56 = vld [vmem:[#allocation8 + $0xd8] sm:$0xf0]  ;;  %v3414_v54 = vld [vmem:[#allocation8 + $0x88] sm:$0xf0] }
  0xe9   :  { %1709 = vmatmul.bf16.vlgmr.msrb.gmra.mxu0 %v4299_v42  ;;  %v3364_v42 = vld [vmem:[#allocation8 + $0x20] sm:$0xf]  ;;  %v1405_v17 = vadd.f32 %v1404_v14, %v1391_v9  ;;  %v1418_v18 = vpop.f32.mrf.mxu1  ;;  %v3457_v62 = vor.u32 %v3922_v53, %v3454_v56  ;;  %v3918_v9 = vld [vmem:[#allocation8 + $0xb4] sm:$0xf]  ;;  %v3366_v14 = vld [vmem:[#allocation8 + $0x28] sm:$0xf0] }
  0xea   :  { %v3365_v10 = vor.u32 %v3901_v6, %v3364_v42  ;;  %v3377_v6 = vor.u32 %v3902_v2, %v3374_v3 }
  0xeb   :  { %2146 = vmatpush.bf16.msrb.mxu1 %v3461_v41  ;;  %v1419_v20 = vadd.f32 %v1418_v18, %v1405_v17  ;;  %v3533_v17 = vor.u32 %v3943_v16, %v3532_v15  ;;  %v3534_v16 = vld [vmem:[#allocation8 + $0x178] sm:$0xf0] }
  0xec   :  { %2133 = vmatpush.bf16.msra.mxu3 %v3389_v44  ;;  %v3473_v44 = vor.u32 %v3926_v8, %v3470_v36  ;;  %v1458_v45 = vpop.f32.mrf.mxu2  ;;  %v3350_v36 = vld [vmem:[#allocation8 + $0x8] sm:$0xf0] }
  0xed   :  { %v1433_v27 = vadd.f32 %v1432_v55, %v1419_v20  ;;  %v3898_v20 = vld [vmem:[#allocation8 + $0x14] sm:$0xf]  ;;  %2159 = vmatpush.bf16.msrb.mxu2 %v3533_v17 }
  0xee   :  { %v1446_v61 = vpop.f32.mrf.mxu3 }
  0xef   :  { %2147 = vmatpush.bf16.msrb.mxu1 %v3453_v49  ;;  %v1733_v30 = vmax.f32 %v1433_v27, 0.0  ;;  %v3390_v49 = vld [vmem:[#allocation8 + $0x58] sm:$0xf0]  ;;  %v1447_v12 = vadd.f32 %v1446_v61, %v346_v57  ;;  %v3941_v27 = vld [vmem:[#allocation8 + $0x164] sm:$0xf0]  ;;  %v3501_v61 = vor.u32 %v3935_v59, %v3500_v58 }
  0xf0   :  { %2134 = vmatpush.bf16.msra.mxu3 %v3381_v51  ;;  %v3393_v51 = vor.u32 %v3906_v48, %v3390_v49  ;;  %v3525_v29 = vor.u32 %v3941_v27, %v3524_v26  ;;  %v3508_v49 = vld [vmem:[#allocation8 + $0x140] sm:$0xf]  ;;  %v3518_v26 = vld [vmem:[#allocation8 + $0x158] sm:$0xf0] }
  0xf1   :  { %v4330_v41 = vpack.c.bf16 %v1733_v30, %v1729_v34  ;;  %v3422_v34 = vld [vmem:[#allocation8 + $0x98] sm:$0xf0] }
  0xf2   :  { %3345 = vmatmul.msk.bf16.vlgmr.msra.gmra.mxu1 %vm1333_vm0, %v4293_v50  ;;  %v3421_v50 = vor.u32 %v3915_v23, %v3420_v22  ;;  %v3430_v22 = vld [vmem:[#allocation8 + $0xa8] sm:$0xf0]  ;;  %2160 = vmatpush.bf16.msrb.mxu2 %v3525_v29  ;;  %v3957_v29 = vld [vmem:[#allocation8 + $0x1e4] sm:$0xf0] }
  0xf3   :  { %2148 = vmatpush.bf16.msrb.mxu1 %v3445_v37  ;;  %v3920_v37 = vld [vmem:[#allocation8 + $0xc4] sm:$0xf] }
  0xf4   :  { %2135 = vmatpush.bf16.msra.mxu3 %v3373_v1  ;;  %v1445_v1 = vadd.f32 %v1444_v38, %v346_v57  ;;  %v1460_v5 = vpop.f32.mrf.mxu2  ;;  %v3449_v42 = vor.u32 %v3920_v37, %v3446_v0  ;;  %v3516_v38 = vld [vmem:[#allocation8 + $0x150] sm:$0xf]  ;;  %v3492_v37 = vld [vmem:[#allocation8 + $0x120] sm:$0xf]  ;;  %v3933_v0 = vld [vmem:[#allocation8 + $0x124] sm:$0xf0] }
  0xf5   :  { %v1461_v24 = vadd.f32 %v1460_v5, %v1447_v12  ;;  %v3493_v2 = vor.u32 %v3933_v0, %v3492_v37 }
  0xf6   :  { %v1459_v11 = vadd.f32 %v1458_v45, %v1445_v1  ;;  %v3353_v45 = vor.u32 %v3896_v32, %v3350_v36 }
  0xf7   :  { %2149 = vmatpush.bf16.msrb.mxu1 %v3437_v7  ;;  %v3900_v7 = vld [vmem:[#allocation8 + $0x24] sm:$0xf] }
  0xf8   :  { %2136 = vmatpush.bf16.msra.mxu3 %v3365_v10  ;;  %v3438_v10 = vld [vmem:[#allocation8 + $0xb8] sm:$0xf0] }
  0xf9   :  { %v3441_v18 = vor.u32 %v3918_v9, %v3438_v10  ;;  %v3484_v9 = vld [vmem:[#allocation8 + $0x110] sm:$0xf]  ;;  %v3931_v10 = vld [vmem:[#allocation8 + $0x114] sm:$0xf0] }
  0xfb   :  { %2150 = vmatpush.bf16.msrb.mxu1 %v3429_v19  ;;  %v3369_v19 = vor.u32 %v3900_v7, %v3366_v14  ;;  %v3929_v14 = vld [vmem:[#allocation8 + $0x104] sm:$0xf0] }
  0xfc   :  { %2137 = vmatpush.bf16.msra.mxu3 %v3357_v21  ;;  %v3916_v21 = vld [vmem:[#allocation8 + $0xa4] sm:$0xf] }
  0xfe   :  { %v1472_v4 = vpop.f32.mrf.mxu0 }
  0xff   :  { %2151 = vmatpush.bf16.msrb.mxu1 %v3421_v50  ;;  %v1486_v13 = vpop.f32.mrf.mxu1  ;;  %v1473_v23 = vadd.f32 %v1472_v4, %v1459_v11  ;;  %v3433_v50 = vor.u32 %v3916_v21, %v3430_v22  ;;  %v3485_v11 = vor.u32 %v3931_v10, %v3484_v9  ;;  %v3596_v21 = vld [vmem:[#allocation8 + $0x1f0] sm:$0xf]  ;;  %v3959_v22 = vld [vmem:[#allocation8 + $0x1f4] sm:$0xf0] }
 0x100   :  { %2138 = vmatpush.bf16.msra.mxu3 %v3349_v31  ;;  %v3361_v31 = vor.u32 %v3898_v20, %v3358_v25  ;;  %v3597_v25 = vor.u32 %v3959_v22, %v3596_v21  ;;  %v3548_v10 = vld [vmem:[#allocation8 + $0x190] sm:$0xf]  ;;  %v3958_v22 = vld [vmem:[#allocation8 + $0x1f4] sm:$0xf] }
 0x102   :  { %2173 = vmatpush.bf16.msra.mxu0 %v3597_v25 }
 0x103   :  { %2139 = vmatmul.bf16.vlgmr.msra.gmra.mxu3 %v4330_v41  ;;  %2152 = vmatpush.bf16.msrb.mxu1 %v3413_v43  ;;  %v3517_v43 = vor.u32 %v3939_v39, %v3516_v38  ;;  %v3934_v38 = vld [vmem:[#allocation8 + $0x134] sm:$0xf]  ;;  %v3502_v39 = vld [vmem:[#allocation8 + $0x138] sm:$0xf0] }
 0x104   :  { %2187 = vmatpush.bf16.msrb.mxu3 %v3409_v35  ;;  %v1487_v35 = vadd.f32 %v1486_v13, %v1473_v23  ;;  %v3476_v13 = vld [vmem:[#allocation8 + $0x100] sm:$0xf]  ;;  %v3938_v23 = vld [vmem:[#allocation8 + $0x154] sm:$0xf] }
 0x105   :  { %2161 = vmatpush.bf16.msrb.mxu2 %v3517_v43  ;;  %v3477_v15 = vor.u32 %v3929_v14, %v3476_v13  ;;  %v3521_v27 = vor.u32 %v3938_v23, %v3518_v26  ;;  %v3572_v43 = vld [vmem:[#allocation8 + $0x1c0] sm:$0xf]  ;;  %v3598_v23 = vld [vmem:[#allocation8 + $0x1f8] sm:$0xf0] }
 0x106   :  { %v1500_v55 = vpop.f32.mrf.mxu3  ;;  %v1474_v28 = vpop.f32.mrf.mxu0  ;;  %v3601_v25 = vor.u32 %v3958_v22, %v3598_v23 }
 0x107   :  { %2201 = vmatpush.bf16.msra.mxu1 %v3473_v44  ;;  %v1475_v8 = vadd.f32 %v1474_v28, %v1461_v24  ;;  %v1488_v40 = vpop.f32.mrf.mxu1  ;;  %v3425_v44 = vor.u32 %v3914_v33, %v3422_v34  ;;  %v1501_v47 = vadd.f32 %v1500_v55, %v1487_v35  ;;  %v3588_v28 = vld [vmem:[#allocation8 + $0x1e0] sm:$0xf]  ;;  %v3580_v34 = vld [vmem:[#allocation8 + $0x1d0] sm:$0xf]  ;;  %v3955_v35 = vld [vmem:[#allocation8 + $0x1d4] sm:$0xf0] }
 0x108   :  { %2188 = vmatpush.bf16.msrb.mxu3 %v3401_v46  ;;  %v3912_v46 = vld [vmem:[#allocation8 + $0x84] sm:$0xf]  ;;  %v3581_v36 = vor.u32 %v3955_v35, %v3580_v34  ;;  %v3582_v34 = vld [vmem:[#allocation8 + $0x1d8] sm:$0xf0] }
 0x109   :  { %v1489_v48 = vadd.f32 %v1488_v40, %v1475_v8  ;;  %v3417_v57 = vor.u32 %v3912_v46, %v3414_v54  ;;  %v347_v8 = vperm.slane %v4321_v52, 2  ;;  %v3505_v40 = vor.u32 %v3934_v38, %v3502_v39 }
 0x10b   :  { %2202 = vmatpush.bf16.msra.mxu1 %v3465_v60  ;;  %v1514_v30 = vpop.f32.mrf.mxu2  ;;  %v3937_v60 = vld [vmem:[#allocation8 + $0x144] sm:$0xf0] }
 0x10c   :  { %2189 = vmatpush.bf16.msrb.mxu3 %v3393_v51  ;;  %v3509_v56 = vor.u32 %v3937_v60, %v3508_v49 }
 0x10e   :  { %v1502_v51 = vpop.f32.mrf.mxu3  ;;  %v1528_v53 = vpop.f32.mrf.mxu0  ;;  %2162 = vmatpush.bf16.msrb.mxu2 %v3509_v56  ;;  %v3930_v56 = vld [vmem:[#allocation8 + $0x114] sm:$0xf] }
 0x10f   :  { %2203 = vmatpush.bf16.msra.mxu1 %v3457_v62  ;;  %v1515_v62 = vadd.f32 %v1514_v30, %v1501_v47  ;;  %v3589_v30 = vor.u32 %v3957_v29, %v3588_v28  ;;  %v3956_v28 = vld [vmem:[#allocation8 + $0x1e4] sm:$0xf]  ;;  %v3590_v29 = vld [vmem:[#allocation8 + $0x1e8] sm:$0xf0] }
 0x110   :  { %2190 = vmatpush.bf16.msrb.mxu3 %v3385_v63  ;;  %v1503_v63 = vadd.f32 %v1502_v51, %v1489_v48  ;;  %v3494_v48 = vld [vmem:[#allocation8 + $0x128] sm:$0xf0]  ;;  %v3564_v51 = vld [vmem:[#allocation8 + $0x1b0] sm:$0xf] }
 0x111   :  { %v1529_v3 = vadd.f32 %v1528_v53, %v1515_v62  ;;  %2174 = vmatpush.bf16.msra.mxu0 %v3589_v30  ;;  %v3951_v53 = vld [vmem:[#allocation8 + $0x1b4] sm:$0xf0] }
 0x112   :  { %2163 = vmatpush.bf16.msrb.mxu2 %v3501_v61  ;;  %v3565_v59 = vor.u32 %v3951_v53, %v3564_v51  ;;  %v3486_v61 = vld [vmem:[#allocation8 + $0x118] sm:$0xf0]  ;;  %v3948_v53 = vld [vmem:[#allocation8 + $0x1a4] sm:$0xf] }
 0x113   :  { %2204 = vmatpush.bf16.msra.mxu1 %v3449_v42  ;;  %v1516_v1 = vpop.f32.mrf.mxu2  ;;  %v3489_v37 = vor.u32 %v3930_v56, %v3486_v61  ;;  %v3558_v56 = vld [vmem:[#allocation8 + $0x1a8] sm:$0xf0]  ;;  %v3550_v61 = vld [vmem:[#allocation8 + $0x198] sm:$0xf0] }
 0x114   :  { %2191 = vmatpush.bf16.msrb.mxu3 %v3377_v6  ;;  %v1517_v4 = vadd.f32 %v1516_v1, %v1503_v63  ;;  %v1730_v6 = vmax.f32 %v1529_v3, 0.0  ;;  %v3949_v3 = vld [vmem:[#allocation8 + $0x1a4] sm:$0xf0] }
 0x115   :  { %2175 = vmatpush.bf16.msra.mxu0 %v3581_v36 }
 0x116   :  { %v1530_v5 = vpop.f32.mrf.mxu0  ;;  %2164 = vmatpush.bf16.msrb.mxu2 %v3493_v2  ;;  %v3556_v2 = vld [vmem:[#allocation8 + $0x1a0] sm:$0xf] }
 0x117   :  { %2205 = vmatpush.bf16.msra.mxu1 %v3441_v18  ;;  %v1531_v42 = vadd.f32 %v1530_v5, %v1517_v4  ;;  %v3940_v18 = vld [vmem:[#allocation8 + $0x164] sm:$0xf]  ;;  %v3557_v5 = vor.u32 %v3949_v3, %v3556_v2  ;;  %v3542_v3 = vld [vmem:[#allocation8 + $0x188] sm:$0xf0] }
 0x118   :  { %2192 = vmatpush.bf16.msrb.mxu3 %v3369_v19  ;;  %v3526_v19 = vld [vmem:[#allocation8 + $0x168] sm:$0xf0]  ;;  %v3928_v4 = vld [vmem:[#allocation8 + $0x104] sm:$0xf] }
 0x119   :  { %v1734_v7 = vmax.f32 %v1531_v42, 0.0  ;;  %v3529_v20 = vor.u32 %v3940_v18, %v3526_v19  ;;  %v3478_v42 = vld [vmem:[#allocation8 + $0x108] sm:$0xf0]  ;;  %v3945_v18 = vld [vmem:[#allocation8 + $0x184] sm:$0xf0] }
 0x11a   :  { %2165 = vmatpush.bf16.msrb.mxu2 %v3485_v11  ;;  %v3481_v9 = vor.u32 %v3928_v4, %v3478_v42  ;;  %v3947_v11 = vld [vmem:[#allocation8 + $0x194] sm:$0xf0] }
 0x11b   :  { %2206 = vmatpush.bf16.msra.mxu1 %v3433_v50  ;;  %v1738_v12 = vpack.c.bf16 %v1734_v7, %v1730_v6  ;;  %v3936_v50 = vld [vmem:[#allocation8 + $0x144] sm:$0xf]  ;;  %v3549_v13 = vor.u32 %v3947_v11, %v3548_v10 }
 0x11c   :  { %2193 = vmatpush.bf16.msrb.mxu3 %v3361_v31  ;;  %v3510_v31 = vld [vmem:[#allocation8 + $0x148] sm:$0xf0] }
 0x11d   :  { %2153 = vmatmul.bf16.vlgmr.msrb.gmra.mxu1 %v1738_v12  ;;  %v3513_v32 = vor.u32 %v3936_v50, %v3510_v31  ;;  %v3593_v31 = vor.u32 %v3956_v28, %v3590_v29  ;;  %v3975_v28 = vld [vmem:[#allocation10 + $0x78] sm:$0xff]  ;;  %v3962_v29 = vld [vmem:[#allocation10 + $0x10] sm:$0xff] }
 0x11e   :  { %2166 = vmatpush.bf16.msrb.mxu2 %v3477_v15 }
 0x11f   :  { %2207 = vmatpush.bf16.msra.mxu1 %v3425_v44  ;;  %v1542_v24 = vpop.f32.mrf.mxu1  ;;  %v3953_v44 = vld [vmem:[#allocation8 + $0x1c4] sm:$0xf0] }
 0x120   :  { %2194 = vmatpush.bf16.msrb.mxu3 %v3353_v45  ;;  %v3932_v45 = vld [vmem:[#allocation8 + $0x124] sm:$0xf]  ;;  %v3573_v47 = vor.u32 %v3953_v44, %v3572_v43  ;;  %v1543_v60 = vadd.f32 %v1542_v24, %v347_v8  ;;  %v3574_v44 = vld [vmem:[#allocation8 + $0x1c8] sm:$0xf0] }
 0x121   :  { %v3497_v49 = vor.u32 %v3932_v45, %v3494_v48  ;;  %v3952_v43 = vld [vmem:[#allocation8 + $0x1c4] sm:$0xf] }
 0x122   :  { %v1570_v55 = vpop.f32.mrf.mxu0  ;;  %2176 = vmatpush.bf16.msra.mxu0 %v3573_v47  ;;  %v3577_v45 = vor.u32 %v3952_v43, %v3574_v44  ;;  %v348_v47 = vperm.slane %v4321_v52, 3  ;;  %v3944_v52 = vld [vmem:[#allocation8 + $0x184] sm:$0xf] }
 0x123   :  { %2195 = vmatmul.bf16.vlgmr.msrb.gmra.mxu3 %v4330_v41  ;;  %2208 = vmatpush.bf16.msra.mxu1 %v3417_v57  ;;  %v3942_v41 = vld [vmem:[#allocation8 + $0x174] sm:$0xf]  ;;  %v3968_v43 = vld [vmem:[#allocation10 + $0x40] sm:$0xff] }
 0x124   :  { %v3537_v17 = vor.u32 %v3942_v41, %v3534_v16 }
 0x126   :  { %2215 = vmatpush.bf16.msra.mxu2 %v3537_v17  ;;  %v1556_v33 = vpop.f32.mrf.mxu3  ;;  %2177 = vmatpush.bf16.msra.mxu0 %v3565_v59  ;;  %v3540_v17 = vld [vmem:[#allocation8 + $0x180] sm:$0xf]  ;;  %v3946_v59 = vld [vmem:[#allocation8 + $0x194] sm:$0xf] }
 0x127   :  { %v1544_v46 = vpop.f32.mrf.mxu1  ;;  %v1557_v62 = vadd.f32 %v1556_v33, %v1543_v60  ;;  %v3541_v21 = vor.u32 %v3945_v18, %v3540_v17  ;;  %v3954_v33 = vld [vmem:[#allocation8 + $0x1d4] sm:$0xf]  ;;  %2395 = vmatpush.bf16.msrb.mxu1 %v3975_v28 }
 0x128   :  { %v1545_v63 = vadd.f32 %v1544_v46, %v347_v8  ;;  %v3585_v36 = vor.u32 %v3954_v33, %v3582_v34  ;;  %v3950_v46 = vld [vmem:[#allocation8 + $0x1b4] sm:$0xf]  ;;  %v3972_v33 = vld [vmem:[#allocation10 + $0x60] sm:$0xff]  ;;  %v3971_v34 = vld [vmem:[#allocation10 + $0x58] sm:$0xff] }
 0x129   :  { %v1571_v6 = vadd.f32 %v1570_v55, %v1557_v62  ;;  %v3553_v62 = vor.u32 %v3946_v59, %v3550_v61 }
 0x12a   :  { %2216 = vmatpush.bf16.msra.mxu2 %v3529_v20  ;;  %v1572_v54 = vpop.f32.mrf.mxu0  ;;  %2178 = vmatpush.bf16.msra.mxu0 %v3557_v5  ;;  %v3545_v5 = vor.u32 %v3944_v52, %v3542_v3 }
 0x12b   :  { %v1584_v57 = vpop.f32.mrf.mxu2 }
 0x12c   :  { %v1585_v14 = vadd.f32 %v1584_v57, %v1571_v6 }
 0x12d   :  { %2209 = vmatmul.bf16.vlgmr.msra.gmra.mxu1 %v1738_v12 }
 0x12e   :  { %2217 = vmatpush.bf16.msra.mxu2 %v3521_v27  ;;  %v1558_v58 = vpop.f32.mrf.mxu3  ;;  %2179 = vmatpush.bf16.msra.mxu0 %v3549_v13 }
 0x12f   :  { %v1559_v7 = vadd.f32 %v1558_v58, %v1545_v63  ;;  %v3561_v58 = vor.u32 %v3948_v53, %v3558_v56 }
 0x131   :  { %v1573_v15 = vadd.f32 %v1572_v54, %v1559_v7  ;;  %v3566_v54 = vld [vmem:[#allocation8 + $0x1b8] sm:$0xf0] }
 0x132   :  { %2218 = vmatpush.bf16.msra.mxu2 %v3513_v32  ;;  %v1626_v1 = vpop.f32.mrf.mxu0  ;;  %2180 = vmatpush.bf16.msra.mxu0 %v3541_v21  ;;  %v3569_v48 = vor.u32 %v3950_v46, %v3566_v54  ;;  %v3983_v54 = vld [vmem:[#allocation11 + $0x38] sm:$0xff] }
 0x133   :  { %v1586_v41 = vpop.f32.mrf.mxu2 }
 0x134   :  { %v1587_v24 = vadd.f32 %v1586_v41, %v1573_v15 }
 0x136   :  { %2219 = vmatpush.bf16.msra.mxu2 %v3505_v40  ;;  %2229 = vmatpush.bf16.msrb.mxu0 %v3601_v25  ;;  %v3965_v25 = vld [vmem:[#allocation10 + $0x28] sm:$0xff] }
 0x13a   :  { %2220 = vmatpush.bf16.msra.mxu2 %v3497_v49  ;;  %v1628_v20 = vpop.f32.mrf.mxu0  ;;  %2230 = vmatpush.bf16.msrb.mxu0 %v3593_v31  ;;  %v3973_v31 = vld [vmem:[#allocation10 + $0x68] sm:$0xff] }
 0x13e   :  { %2221 = vmatpush.bf16.msra.mxu2 %v3489_v37  ;;  %2231 = vmatpush.bf16.msrb.mxu0 %v3585_v36 }
 0x13f   :  { %v1598_v0 = vpop.f32.mrf.mxu1 }
 0x140   :  { %v1599_v16 = vadd.f32 %v1598_v0, %v1585_v14 }
 0x142   :  { %2222 = vmatpush.bf16.msra.mxu2 %v3481_v9  ;;  %2232 = vmatpush.bf16.msrb.mxu0 %v3577_v45 }
 0x146   :  { %v1612_v12 = vpop.f32.mrf.mxu3  ;;  %v1654_v39 = vpop.f32.mrf.mxu0  ;;  %2233 = vmatpush.bf16.msrb.mxu0 %v3569_v48 }
 0x147   :  { %v1600_v19 = vpop.f32.mrf.mxu1  ;;  %v1613_v55 = vadd.f32 %v1612_v12, %v1599_v16 }
 0x148   :  { %v1601_v26 = vadd.f32 %v1600_v19, %v1587_v24  ;;  %v3967_v24 = vld [vmem:[#allocation10 + $0x38] sm:$0xff] }
 0x149   :  { %v1627_v50 = vadd.f32 %v1626_v1, %v1613_v55  ;;  %2381 = vmatpush.bf16.msra.mxu3 %v3967_v24  ;;  %v3966_v55 = vld [vmem:[#allocation10 + $0x30] sm:$0xff]  ;;  %v3976_v24 = vld [vmem:[#allocation11] sm:$0xff] }
 0x14a   :  { %2234 = vmatpush.bf16.msrb.mxu0 %v3561_v58 }
 0x14b   :  { %v1731_v35 = vmax.f32 %v1627_v50, 0.0  ;;  %v1640_v38 = vpop.f32.mrf.mxu2  ;;  %v3974_v50 = vld [vmem:[#allocation10 + $0x70] sm:$0xff] }
 0x14c   :  { %v1641_v57 = vadd.f32 %v1640_v38, %v348_v47  ;;  %2396 = vmatpush.bf16.msrb.mxu1 %v3974_v50 }
 0x14d   :  { %2382 = vmatpush.bf16.msra.mxu3 %v3966_v55 }
 0x14e   :  { %v1614_v27 = vpop.f32.mrf.mxu3  ;;  %v1656_v51 = vpop.f32.mrf.mxu0  ;;  %v1655_v63 = vadd.f32 %v1654_v39, %v1641_v57  ;;  %2235 = vmatpush.bf16.msrb.mxu0 %v3553_v62  ;;  %v3969_v39 = vld [vmem:[#allocation10 + $0x48] sm:$0xff] }
 0x14f   :  { %v1615_v30 = vadd.f32 %v1614_v27, %v1601_v26  ;;  %v3964_v26 = vld [vmem:[#allocation10 + $0x20] sm:$0xff]  ;;  %v3963_v27 = vld [vmem:[#allocation10 + $0x18] sm:$0xff] }
 0x150   :  { %2397 = vmatpush.bf16.msrb.mxu1 %v3973_v31 }
 0x151   :  { %v1629_v32 = vadd.f32 %v1628_v20, %v1615_v30  ;;  %2383 = vmatpush.bf16.msra.mxu3 %v3965_v25  ;;  %v3961_v30 = vld [vmem:[#allocation10 + $0x8] sm:$0xff] }
 0x152   :  { %2236 = vmatpush.bf16.msrb.mxu0 %v3545_v5 }
 0x153   :  { %v1735_v8 = vmax.f32 %v1629_v32, 0.0  ;;  %v1642_v60 = vpop.f32.mrf.mxu2  ;;  %v3960_v32 = vld [vmem:[#allocation10] sm:$0xff] }
 0x154   :  { %v1643_v0 = vadd.f32 %v1642_v60, %v348_v47  ;;  %2398 = vmatpush.bf16.msrb.mxu1 %v3972_v33  ;;  %v3982_v60 = vld [vmem:[#allocation11 + $0x30] sm:$0xff] }
 0x155   :  { %v1739_v40 = vpack.c.bf16 %v1735_v8, %v1731_v35  ;;  %2384 = vmatpush.bf16.msra.mxu3 %v3964_v26  ;;  %v3970_v35 = vld [vmem:[#allocation10 + $0x50] sm:$0xff]  ;;  %v4004_v26 = vld [vmem:[%s4358_s6] ss:$0 sm:$0xff]  ;;  %s4206_s6 = smov [#allocation13]  }
 0x156   :  { %v1657_v42 = vadd.f32 %v1656_v51, %v1643_v0 }
 0x157   :  { %2167 = vmatmul.bf16.vlgmr.msrb.gmra.mxu2 %v1739_v40 }
 0x158   :  { %2399 = vmatpush.bf16.msrb.mxu1 %v3971_v34  ;;  %2480 = vmatpush.bf16.msrb.mxu2 %v3983_v54 }
 0x159   :  { %2385 = vmatpush.bf16.msra.mxu3 %v3963_v27 }
 0x15c   :  { %2400 = vmatpush.bf16.msrb.mxu1 %v3970_v35  ;;  %2481 = vmatpush.bf16.msrb.mxu2 %v3982_v60  ;;  %v4005_v35 = vld [vmem:[%s4360_s8] ss:$0 sm:$0xff]  ;;  %s2540_s8 = sshll.u32 %s4206_s6, 4  ;;  %s2541_s8 = int_to_ptr.vmem [resolvable:$true] %s2540_s8 }
 0x15d   :  { %2386 = vmatpush.bf16.msra.mxu3 %v3962_v29 }
 0x15f   :  { %v1668_v49 = vpop.f32.mrf.mxu1 }
 0x160   :  { %v1669_v4 = vadd.f32 %v1668_v49, %v1655_v63  ;;  %2401 = vmatpush.bf16.msrb.mxu1 %v3969_v39 }
 0x161   :  { %2387 = vmatpush.bf16.msra.mxu3 %v3961_v30 }
 0x164   :  { %2402 = vmatpush.bf16.msrb.mxu1 %v3968_v43 }
 0x165   :  { %2388 = vmatpush.bf16.msra.mxu3 %v3960_v32 }
 0x166   :  { %v1682_v37 = vpop.f32.mrf.mxu3  ;;  %v1710_v6 = vpop.f32.mrf.mxu0 }
 0x167   :  { %v1670_v1 = vpop.f32.mrf.mxu1  ;;  %2223 = vmatmul.bf16.vlgmr.msra.gmra.mxu2 %v1739_v40  ;;  %v1683_v7 = vadd.f32 %v1682_v37, %v1669_v4  ;;  %v1805_v40 = vld [vmem:[%s4356_s4] sm:$0x3] }
 0x168   :  { %v1671_v9 = vadd.f32 %v1670_v1, %v1657_v42  ;;  %v1807_v44 = vperm.slane %v1805_v40, 0  ;;  %v1808_v52 = vperm.slane %v1805_v40, 1 }
 0x16b   :  { %v1696_v2 = vpop.f32.mrf.mxu2 }
 0x16c   :  { %v1697_v13 = vadd.f32 %v1696_v2, %v1683_v7 }
 0x16e   :  { %v1684_v10 = vpop.f32.mrf.mxu3  ;;  %v1711_v41 = vadd.f32 %v1710_v6, %v1697_v13  ;;  %v1712_v16 = vpop.f32.mrf.mxu0 }
 0x16f   :  { %v1685_v11 = vadd.f32 %v1684_v10, %v1671_v9  ;;  %v1724_v12 = vpop.f32.mrf.mxu1 }
 0x170   :  { %v1725_v17 = vadd.f32 %v1724_v12, %v1711_v41 }
 0x172   :  { %v1732_v21 = vmax.f32 %v1725_v17, 0.0 }
 0x173   :  { %v1698_v14 = vpop.f32.mrf.mxu2 }
 0x174   :  { %v1699_v15 = vadd.f32 %v1698_v14, %v1685_v11 }
 0x176   :  { %v1713_v18 = vadd.f32 %v1712_v16, %v1699_v15 }
 0x177   :  { %v1726_v19 = vpop.f32.mrf.mxu1 }
 0x178   :  { %v1727_v20 = vadd.f32 %v1726_v19, %v1713_v18  ;;  %v3981_v19 = vld [vmem:[#allocation11 + $0x28] sm:$0xff] }
 0x179   :  { %2482 = vmatpush.bf16.msrb.mxu2 %v3981_v19 }
 0x17a   :  { %v1736_v22 = vmax.f32 %v1727_v20, 0.0  ;;  %v3980_v20 = vld [vmem:[#allocation11 + $0x20] sm:$0xff] }
 0x17c   :  { %v1740_v23 = vpack.c.bf16 %v1736_v22, %v1732_v21  ;;  %v3979_v21 = vld [vmem:[#allocation11 + $0x18] sm:$0xff]  ;;  %v3978_v22 = vld [vmem:[#allocation11 + $0x10] sm:$0xff] }
 0x17d   :  { %2483 = vmatpush.bf16.msrb.mxu2 %v3980_v20 }
 0x17e   :  { %2181 = vmatmul.bf16.vlgmr.msra.gmra.mxu0 %v1740_v23 }
 0x181   :  { %2484 = vmatpush.bf16.msrb.mxu2 %v3979_v21 }
 0x185   :  { %2485 = vmatpush.bf16.msrb.mxu2 %v3978_v22 }
 0x186   :  { %v2140_v8 = vpop.f32.mrf.mxu3 }
 0x187   :  { %v2141_v49 = vadd.f32 %v2140_v8, %v1807_v44 }
 0x18e   :  { %2237 = vmatmul.bf16.vlgmr.msrb.gmra.mxu0 %v1740_v23  ;;  %v2142_v45 = vpop.f32.mrf.mxu3  ;;  %v3977_v23 = vld [vmem:[#allocation11 + $0x8] sm:$0xff] }
 0x18f   :  { %v2143_v51 = vadd.f32 %v2142_v45, %v1807_v44  ;;  %2486 = vmatpush.bf16.msrb.mxu2 %v3977_v23 }
 0x193   :  { %2487 = vmatpush.bf16.msrb.mxu2 %v3976_v24 }
 0x19a   :  { %v2154_v36 = vpop.f32.mrf.mxu1 }
 0x19b   :  { %v2155_v53 = vadd.f32 %v2154_v36, %v2141_v49 }
 0x1a2   :  { %v2156_v46 = vpop.f32.mrf.mxu1 }
 0x1a3   :  { %v2157_v56 = vadd.f32 %v2156_v46, %v2143_v51 }
 0x1a6   :  { %v2196_v58 = vpop.f32.mrf.mxu3 }
 0x1a7   :  { %v2197_v42 = vadd.f32 %v2196_v58, %v1808_v52 }
 0x1aa   :  { %v2210_v62 = vpop.f32.mrf.mxu1 }
 0x1ab   :  { %v2211_v9 = vadd.f32 %v2210_v62, %v2197_v42 }
 0x1ae   :  { %v2198_v4 = vpop.f32.mrf.mxu3 }
 0x1af   :  { %v2199_v7 = vadd.f32 %v2198_v4, %v1808_v52 }
 0x1b2   :  { %v2212_v6 = vpop.f32.mrf.mxu1 }
 0x1b3   :  { %v2213_v11 = vadd.f32 %v2212_v6, %v2199_v7 }
 0x1da   :  { %v2168_v38 = vpop.f32.mrf.mxu2 }
 0x1db   :  { %v2169_v57 = vadd.f32 %v2168_v38, %v2155_v53 }
 0x1e2   :  { %v2170_v47 = vpop.f32.mrf.mxu2 }
 0x1e3   :  { %v2171_v59 = vadd.f32 %v2170_v47, %v2157_v56 }
 0x1ea   :  { %v2224_v0 = vpop.f32.mrf.mxu2 }
 0x1eb   :  { %v2225_v12 = vadd.f32 %v2224_v0, %v2211_v9 }
 0x1f2   :  { %v2226_v10 = vpop.f32.mrf.mxu2 }
 0x1f3   :  { %v2227_v13 = vadd.f32 %v2226_v10, %v2213_v11 }
 0x1fb   :  { %v2182_v48 = vpop.f32.mrf.mxu0 }
 0x1fc   :  { %v2183_v61 = vadd.f32 %v2182_v48, %v2169_v57 }
 0x1fe   :  { %v2243_v1 = vmax.f32 %v2183_v61, 0.0 }
 0x203   :  { %v2184_v63 = vpop.f32.mrf.mxu0 }
 0x204   :  { %v2185_v37 = vadd.f32 %v2184_v63, %v2171_v59 }
 0x206   :  { %v2245_v2 = vmax.f32 %v2185_v37, 0.0 }
 0x208   :  { %v2247_v3 = vpack.c.bf16 %v2245_v2, %v2243_v1 }
 0x20a   :  { %2389 = vmatmul.bf16.vlgmr.msra.gmra.mxu3 %v2247_v3 }
 0x20b   :  { %v2238_v5 = vpop.f32.mrf.mxu0 }
 0x20c   :  { %v2239_v14 = vadd.f32 %v2238_v5, %v2225_v12 }
 0x20e   :  { %v2244_v16 = vmax.f32 %v2239_v14, 0.0 }
 0x213   :  { %v2240_v15 = vpop.f32.mrf.mxu0 }
 0x214   :  { %v2241_v41 = vadd.f32 %v2240_v15, %v2227_v13 }
 0x216   :  { %v2246_v17 = vmax.f32 %v2241_v41, 0.0 }
 0x218   :  { %v2248_v18 = vpack.c.bf16 %v2246_v17, %v2244_v16 }
 0x21a   :  { %2403 = vmatmul.bf16.vlgmr.msrb.gmra.mxu1 %v2248_v18 }
 0x28d   :  { %v2390_v55 = vpop.f32.mrf.mxu3 }
 0x28e   :  { %v2391_v28 = vadd.f32 %v4004_v26, %v2390_v55 }
 0x295   :  { %v2392_v27 = vpop.f32.mrf.mxu3 }
 0x296   :  { %v2393_v29 = vadd.f32 %v4004_v26, %v2392_v27 }
 0x297   :  { %v2404_v25 = vpop.f32.mrf.mxu1 }
 0x298   :  { %v2405_v50 = vadd.f32 %v2404_v25, %v2391_v28 }
 0x29a   :  { %v2409_v32 = vmax.f32 %v2405_v50, 0.0 }
 0x29f   :  { %v2406_v30 = vpop.f32.mrf.mxu1 }
 0x2a0   :  { %v2407_v31 = vadd.f32 %v2406_v30, %v2393_v29 }
 0x2a2   :  { %v2410_v33 = vmax.f32 %v2407_v31, 0.0 }
 0x2a4   :  { %v2411_v34 = vpack.c.bf16 %v2410_v33, %v2409_v32 }
 0x2a6   :  { %2488 = vmatmul.bf16.vlgmr.msrb.gmra.mxu2 %v2411_v34 }
 0x329   :  { %v2489_v8 = vpop.f32.mrf.mxu2 }
 0x32a   :  { %v2490_v36 = vadd.f32 %v4005_v35, %v2489_v8 }
 0x32c   :  { %v3698_v38 = vmul.f32 -1.442695, %v2490_v36 }
 0x32e   :  { %4006 = vpow2.f32 %v3698_v38 }
 0x331   :  { %v2491_v39 = vpop.f32.mrf.mxu2 }
 0x332   :  { %v2492_v40 = vadd.f32 %v4005_v35, %v2491_v39 }
 0x334   :  { %v4007_v43 = vpop.eup %4006  ;;  %v3699_v44 = vmul.f32 -1.442695, %v2492_v40 }
 0x335   :  { %v2500_v45 = vadd.f32 1.0, %v4007_v43 }
 0x336   :  { %4008 = vpow2.f32 %v3699_v44 }
 0x337   :  { %4010 = vrcp.f32 %v2500_v45  ;;  %vm2507_vm2 = vweird.f32 %v2500_v45  ;;  %v2513_v58 = vand.u32 2147483648, %v2500_v45  ;;  %v2511_v61 = vand.u32 2147483647, %v2500_v45 }
 0x339   :  { %v2514_v1 = vor.u32 1.1754944e-38, %v2513_v58  ;;  %vm2512_vm7 = vcmp.eq.f32.partialorder %v2511_v61, 8.507059e+37 }
 0x33c   :  { %v4009_v46 = vpop.eup %4008 }
 0x33d   :  { %v4011_v54 = vpop.eup %4010  ;;  %v2501_v47 = vadd.f32 1.0, %v4009_v46 }
 0x33e   :  { %v2503_v48 = vmul.f32 %v4011_v54, %v2500_v45  ;;  %vm2508_vm1 = vweird.f32 %v4011_v54 }
 0x33f   :  { %4012 = vrcp.f32 %v2501_v47  ;;  %v2528_v59 = vand.u32 2147483648, %v2501_v47  ;;  %v2526_v63 = vand.u32 2147483647, %v2501_v47  ;;  %vm2509_vm4 = vmor %vm2507_vm2, %vm2508_vm1  ;;  %vm2522_vm5 = vweird.f32 %v2501_v47 }
 0x340   :  { %v2504_v49 = vsub.f32 1.0, %v2503_v48 }
 0x341   :  { %v2529_v2 = vor.u32 1.1754944e-38, %v2528_v59  ;;  %vm2527_vm8 = vcmp.eq.f32.partialorder %v2526_v63, 8.507059e+37 }
 0x342   :  { %v2505_v60 = vmul.f32 %v4011_v54, %v2504_v49 }
 0x344   :  { %v2506_v57 = vadd.f32 %v4011_v54, %v2505_v60 }
 0x345   :  { %v4013_v51 = vpop.eup %4012 }
 0x346   :  { %v2518_v53 = vmul.f32 %v4013_v51, %v2501_v47  ;;  %vm2523_vm3 = vweird.f32 %v4013_v51  ;;  %v2510_v37 = vsel %vm2509_vm4, %v4011_v54, %v2506_v57 }
 0x347   :  { %vm2524_vm6 = vmor %vm2522_vm5, %vm2523_vm3  ;;  %v2515_v3 = vsel %vm2512_vm7, %v2514_v1, %v2510_v37 }
 0x348   :  { %v2519_v56 = vsub.f32 1.0, %v2518_v53 }
 0x34a   :  { %v2520_v62 = vmul.f32 %v4013_v51, %v2519_v56 }
 0x34c   :  { %v2521_v0 = vadd.f32 %v4013_v51, %v2520_v62 }
 0x34e   :  { %v2525_v52 = vsel %vm2524_vm6, %v4013_v51, %v2521_v0 }
 0x34f   :  { %v2530_v4 = vsel %vm2527_vm8, %v2529_v2, %v2525_v52 }
 0x350   :  { %v3987_v5 = vpack.c.bf16 %v2530_v4, %v2515_v3 }
 0x352   :  { %3988 = vst [vmem:[#allocation13] sm:$0xff] %v3987_v5  }
 0x353   :  { %2548 = dma.vmem_to_hbm [thread:$0]  %s2541_s8, 128, %s2543_s26, [#allocation4], %s4203_s18, %s4203_s18, %s4204_s19  }
 0x354   :  { %4190 = dma.done.wait [#allocation4], 128  }
 0x355   :  { %4191 = vsyncadd [#allocation4], 4294967168 }
 0x356   :  { %2553 = vsyncpa [#allocation3], 1 }
 0x357   :  { %2554 = vsyncpa [#allocation6], 1 }
 0x358   :  { %2555 = vsyncpa [#allocation9], 1 }
 0x359   :  { %2556 = vsyncpa [#allocation12], 1 }
 0x35a   :  { %2557 = vsyncpa [#allocation4], 1 }

</bundles_post_ra>
